<compile_context>
chip_gen: v5e
topology: v5e:2x2
jax: 0.10.0
libtpu: 0.0.40
codegen_flags: <defaults>
</compile_context>

<pallas_src>
import math

import jax
import jax.numpy as jnp
from jax.experimental import pallas as pl
from jax.experimental.pallas import tpu as pltpu

# Safe on v5e/v6e (128 MiB physical) and v7x (64 MiB physical).
VMEM_LIMIT = 32 * 1024 * 1024


# ----------------------------- Pallas kernels ------------------------------

def _mlp_kernel(z_ref, w1_ref, b1_ref, w2_ref, b2_ref, out_ref):
    # Linear(latent,128) -> ReLU -> Linear(128, C0*S0*S0); bf16 MXU, f32 acc.
    h = jnp.dot(z_ref[...], w1_ref[...], preferred_element_type=jnp.float32)
    h = jnp.maximum(h + b1_ref[...], 0.0)
    out_ref[...] = jnp.dot(h.astype(jnp.bfloat16), w2_ref[...],
                           preferred_element_type=jnp.float32) + b2_ref[...]


def mlp(z_bf16, w1, b1, w2, b2):
    B = z_bf16.shape[0]
    N = w2.shape[1]
    # Single block: B and `flat` are small at these sizes.  If `flat` grows
    # large (big img_size / channels), tile w2 and the output over N.
    return pl.pallas_call(
        _mlp_kernel,
        out_shape=jax.ShapeDtypeStruct((B, N), jnp.float32),
        in_specs=[pl.BlockSpec(memory_space=pltpu.MemorySpace.VMEM)] * 5,
        out_specs=pl.BlockSpec(memory_space=pltpu.MemorySpace.VMEM),
        compiler_params=pltpu.CompilerParams(vmem_limit_bytes=VMEM_LIMIT),
    )(z_bf16, w1, b1, w2, b2)


def _convt_stats_kernel(p_ref, w_ref, b_ref, y_ref, stat_ref):
    # Sub-pixel transposed conv: (tile_m, 9C) @ (9C, 4*Cout) + bias (bf16 MXU).
    y = jnp.dot(p_ref[...], w_ref[...],
                preferred_element_type=jnp.float32) + b_ref[...]
    y_ref[...] = y
    # Per-tile partial BatchNorm statistics (rows 0/1 of an 8-row slab so the
    # output block keeps an (8, lanes)-aligned shape).
    s1 = jnp.sum(y, axis=0, keepdims=True)
    s2 = jnp.sum(y * y, axis=0, keepdims=True)
    pad = jnp.zeros((6, y.shape[1]), jnp.float32)
    stat_ref[...] = jnp.concatenate([s1, s2, pad], axis=0)


def convt_matmul_stats(patches, w_comb, bias4, tile_m):
    M, K = patches.shape
    lanes = w_comb.shape[1]
    nt = M // tile_m
    return pl.pallas_call(
        _convt_stats_kernel,
        out_shape=(jax.ShapeDtypeStruct((M, lanes), jnp.float32),
                   jax.ShapeDtypeStruct((nt * 8, lanes), jnp.float32)),
        grid=(nt,),
        in_specs=[pl.BlockSpec((tile_m, K), lambda i: (i, 0)),
                  pl.BlockSpec((K, lanes), lambda i: (0, 0)),
                  pl.BlockSpec((1, lanes), lambda i: (0, 0))],
        out_specs=(pl.BlockSpec((tile_m, lanes), lambda i: (i, 0)),
                   pl.BlockSpec((8, lanes), lambda i: (i, 0))),
        compiler_params=pltpu.CompilerParams(
            dimension_semantics=("parallel",), vmem_limit_bytes=VMEM_LIMIT),
    )(patches, w_comb, bias4)


def _bn_relu_kernel(y_ref, scale_ref, shift_ref, o_ref):
    # Normalize * gamma + beta folded into per-channel scale/shift, then ReLU.
    o_ref[...] = jnp.maximum(y_ref[...] * scale_ref[...] + shift_ref[...], 0.0)


def bn_relu(y, scale, shift, tile_m):
    M, lanes = y.shape
    nt = M // tile_m
    return pl.pallas_call(
        _bn_relu_kernel,
        out_shape=jax.ShapeDtypeStruct((M, lanes), jnp.float32),
        grid=(nt,),
        in_specs=[pl.BlockSpec((tile_m, lanes), lambda i: (i, 0)),
                  pl.BlockSpec((1, lanes), lambda i: (0, 0)),
                  pl.BlockSpec((1, lanes), lambda i: (0, 0))],
        out_specs=pl.BlockSpec((tile_m, lanes), lambda i: (i, 0)),
        compiler_params=pltpu.CompilerParams(
            dimension_semantics=("parallel",), vmem_limit_bytes=VMEM_LIMIT),
    )(y, scale, shift)


def _bn_relu_conv_tanh_kernel(y_ref, scale_ref, shift_ref, w_ref, b_ref, o_ref):
    # Last block: BN + ReLU fused with the 1x1 Conv (block-diagonal per-phase
    # weight) + Tanh.  tanh runs on the EUP; the matmul is tiny.
    r = jnp.maximum(y_ref[...] * scale_ref[...] + shift_ref[...], 0.0)
    o_ref[...] = jnp.tanh(jnp.dot(r.astype(jnp.bfloat16), w_ref[...],
                                  preferred_element_type=jnp.float32)
                          + b_ref[...])


def bn_relu_conv_tanh(y, scale, shift, w_blk, bias_blk, tile_m):
    M, lanes = y.shape
    out_l = w_blk.shape[1]
    nt = M // tile_m
    return pl.pallas_call(
        _bn_relu_conv_tanh_kernel,
        out_shape=jax.ShapeDtypeStruct((M, out_l), jnp.float32),
        grid=(nt,),
        in_specs=[pl.BlockSpec((tile_m, lanes), lambda i: (i, 0)),
                  pl.BlockSpec((1, lanes), lambda i: (0, 0)),
                  pl.BlockSpec((1, lanes), lambda i: (0, 0)),
                  pl.BlockSpec((lanes, out_l), lambda i: (0, 0)),
                  pl.BlockSpec((1, out_l), lambda i: (0, 0))],
        out_specs=pl.BlockSpec((tile_m, out_l), lambda i: (i, 0)),
        compiler_params=pltpu.CompilerParams(
            dimension_semantics=("parallel",), vmem_limit_bytes=VMEM_LIMIT),
    )(y, scale, shift, w_blk, bias_blk)


# ------------------------------ JAX-side glue -------------------------------

def _choose_tile_m(M, k_cols, max_rows=1024, budget_bytes=4 << 20):
    """Largest power-of-two divisor of M bounded by `max_rows` and a per-buffer
    VMEM budget for the bf16 patch tile, so double-buffered tiles stay well
    under v7x's 64 MiB (and its 32 MiB scoped default)."""
    cap = max(8, min(max_rows, budget_bytes // max(1, 2 * k_cols)))
    t = M & (-M)                      # largest power-of-two divisor of M
    while t > cap:
        t //= 2
    if t < 8:                         # fall back to a single full-extent tile
        t = M
    return t


def _subpixel_patches(x_nhwc):
    """(B,H,W,C) NHWC -> (B*H*W, 9*C) bf16 rows of 3x3 neighbourhoods
    (column order: dh, dw, c)."""
    B, H, W, C = x_nhwc.shape
    xp = jnp.pad(x_nhwc, ((0, 0), (1, 1), (1, 1), (0, 0)))
    cols = [xp[:, dh:dh + H, dw:dw + W, :] for dh in range(3) for dw in range(3)]
    pat = jnp.stack(cols, axis=3)                       # (B, H, W, 9, C)
    return pat.reshape(B * H * W, 9 * C).astype(jnp.bfloat16)


def _pixel_shuffle(y_flat, B, H, W, cout):
    """(B*H*W, 4*cout) with lane order (ph, pw, c) -> (B, 2H, 2W, cout) NHWC."""
    y = y_flat.reshape(B, H, W, 2, 2, cout)
    y = y.transpose(0, 1, 3, 2, 4, 5)                   # interleave parities
    return y.reshape(B, 2 * H, 2 * W, cout)


def _convt_weight_subpixel(w):
    """PyTorch ConvTranspose2d weight (Cin, Cout, 4, 4) -> combined sub-pixel
    matrix (9*Cin, 4*Cout).  Rows ordered (dh, dw, cin) over the 3x3 input
    neighbourhood; cols ordered (ph, pw, cout) over the 4 output parities.
    Derivation (stride 2, pad 1): output row oh = 2i + ph uses
      ph=0: kh=1 at dh=0, kh=3 at dh=-1 ;  ph=1: kh=2 at dh=0, kh=0 at dh=+1
    (same along the width axis); all other taps are zero."""
    cin, cout = w.shape[0], w.shape[1]
    ksel = {(0, 0): 3, (0, 1): 1, (1, 1): 2, (1, 2): 0}   # (parity, d+1) -> k
    wc = jnp.zeros((3, 3, cin, 2, 2, cout), w.dtype)
    for (ph, dh), kh in ksel.items():
        for (pw, dw), kw in ksel.items():
            wc = wc.at[dh, dw, :, ph, pw, :].set(w[:, :, kh, kw])
    return wc.reshape(9 * cin, 4 * cout)


def _bn_scale_shift(stats, M, cout, gamma, beta, eps=1e-5):
    """Fold per-tile (sum, sumsq) slabs into per-channel BN scale/shift,
    replicated to the (ph, pw, cout) lane layout.  Biased batch statistics
    over all N*OH*OW positions = BatchNorm2d training-mode forward."""
    lanes = stats.shape[1]
    st = stats.reshape(-1, 8, lanes)
    s1 = st[:, 0, :].sum(axis=0).reshape(4, cout).sum(axis=0)
    s2 = st[:, 1, :].sum(axis=0).reshape(4, cout).sum(axis=0)
    cnt = 4.0 * M
    mean = s1 / cnt
    var = jnp.maximum(s2 / cnt - mean * mean, 0.0)
    scale_c = gamma * jax.lax.rsqrt(var + eps)
    shift_c = beta - mean * scale_c
    return (jnp.tile(scale_c, 4)[None, :].astype(jnp.float32),
            jnp.tile(shift_c, 4)[None, :].astype(jnp.float32))


# ------------------------------- parameters ---------------------------------

def init_params(key, latent_size, img_size, end_channels, upsamplings):
    keys = jax.random.split(key, 8 + upsamplings)
    flat = end_channels * img_size ** 2 // 2 ** upsamplings
    p = {
        "w1": jax.random.normal(keys[0], (latent_size, 128)) * 0.05,
        "b1": jax.random.normal(keys[1], (128,)) * 0.05,
        "w2": jax.random.normal(keys[2], (128, flat)) * 0.05,
        "b2": jax.random.normal(keys[3], (flat,)) * 0.05,
    }
    blocks = []
    kidx = 4
    for i in range(upsamplings, 0, -1):
        cin = end_channels * 2 ** i
        cout = end_channels * 2 ** (i - 1)
        kb = jax.random.split(keys[kidx], 4)
        kidx += 1
        blocks.append(dict(
            w=jax.random.normal(kb[0], (cin, cout, 4, 4)) * 0.05,  # torch layout
            b=jax.random.normal(kb[1], (cout,)) * 0.05,
            gamma=1.0 + 0.1 * jax.random.normal(kb[2], (cout,)),
            beta=0.1 * jax.random.normal(kb[3], (cout,)),
        ))
    p["blocks"] = blocks
    p["wout"] = jax.random.normal(keys[kidx], (end_channels, 3)) * 0.05
    p["bout"] = jax.random.normal(keys[kidx + 1], (3,)) * 0.05
    return p


def prepare_params(params):
    """Precompute matmul-ready (bf16) weight layouts once, outside the forward."""
    prep = {
        "w1": params["w1"].astype(jnp.bfloat16),
        "b1": params["b1"][None, :].astype(jnp.float32),
        "w2": params["w2"].astype(jnp.bfloat16),
        "b2": params["b2"][None, :].astype(jnp.float32),
    }
    blocks = []
    for blk in params["blocks"]:
        wc = _convt_weight_subpixel(blk["w"]).astype(jnp.bfloat16)
        blocks.append(dict(
            wc=wc,                                                  # (9*Cin, 4*Cout)
            bias4=jnp.tile(blk["b"], 4)[None, :].astype(jnp.float32),
            gamma=blk["gamma"].astype(jnp.float32),
            beta=blk["beta"].astype(jnp.float32),
        ))
    prep["blocks"] = blocks
    ec = params["wout"].shape[0]
    # Block-diagonal (4*ec, 4*3): apply the 1x1 conv to each sub-pixel phase.
    w_blk = jnp.zeros((4 * ec, 4 * 3), jnp.float32)
    for q in range(4):
        w_blk = w_blk.at[q * ec:(q + 1) * ec, q * 3:(q + 1) * 3].set(params["wout"])
    prep["wout_blk"] = w_blk.astype(jnp.bfloat16)
    prep["bout4"] = jnp.tile(params["bout"], 4)[None, :].astype(jnp.float32)
    return prep


# -------------------------------- forward -----------------------------------

def decoder_forward(z, prep, img_size, end_channels, upsamplings):
    B = z.shape[0]
    h = mlp(z.astype(jnp.bfloat16), prep["w1"], prep["b1"], prep["w2"], prep["b2"])
    # nn.Unflatten(dim=1, (C0, S0, S0)) then one-time conversion to NHWC.
    C0 = end_channels * 2 ** upsamplings
    S0 = img_size // 2 ** upsamplings
    x = h.reshape(B, C0, S0, S0).transpose(0, 2, 3, 1)            # (B, S0, S0, C0)

    nblocks = len(prep["blocks"])
    for bi, blk in enumerate(prep["blocks"]):
        _, H, W, _ = x.shape
        cout = blk["gamma"].shape[0]
        M = B * H * W
        patches = _subpixel_patches(x)                            # (M, 9C) bf16
        tile_m = _choose_tile_m(M, patches.shape[1])
        y, stats = convt_matmul_stats(patches, blk["wc"], blk["bias4"], tile_m)
        scale, shift = _bn_scale_shift(stats, M, cout, blk["gamma"], blk["beta"])
        if bi == nblocks - 1:
            # Fused BN + ReLU + 1x1 Conv + Tanh on the last upsampling block.
            out = bn_relu_conv_tanh(y, scale, shift,
                                    prep["wout_blk"], prep["bout4"], tile_m)
            x = _pixel_shuffle(out, B, H, W, 3)
        else:
            r = bn_relu(y, scale, shift, tile_m)
            x = _pixel_shuffle(r, B, H, W, cout)

    return x.transpose(0, 3, 1, 2)                                # NHWC -> NCHW


# ----------------------- pure-JAX reference (check) --------------------------

def reference_forward(z, params, img_size, end_channels, upsamplings):
    B = z.shape[0]
    h = jnp.maximum(z @ params["w1"] + params["b1"], 0.0)
    h = h @ params["w2"] + params["b2"]
    C0 = end_channels * 2 ** upsamplings
    S0 = img_size // 2 ** upsamplings
    x = h.reshape(B, C0, S0, S0)
    for blk in params["blocks"]:
        ker = jnp.flip(blk["w"], (2, 3)).transpose(1, 0, 2, 3)    # (Cout,Cin,K,K)
        y = jax.lax.conv_general_dilated(
            x, ker, window_strides=(1, 1), padding=[(2, 2), (2, 2)],
            lhs_dilation=(2, 2),
            dimension_numbers=("NCHW", "OIHW", "NCHW"),
            precision=jax.lax.Precision.HIGHEST)
        y = y + blk["b"].reshape(1, -1, 1, 1)
        mean = y.mean(axis=(0, 2, 3), keepdims=True)
        var = ((y - mean) ** 2).mean(axis=(0, 2, 3), keepdims=True)
        y = (y - mean) / jnp.sqrt(var + 1e-5)
        y = y * blk["gamma"].reshape(1, -1, 1, 1) + blk["beta"].reshape(1, -1, 1, 1)
        x = jnp.maximum(y, 0.0)
    y = jnp.einsum("bchw,co->bohw", x, params["wout"],
                   precision=jax.lax.Precision.HIGHEST)
    y = y + params["bout"].reshape(1, -1, 1, 1)
    return jnp.tanh(y)


if __name__ == "__main__":
    # Small shapes consistent with the module: img_size=16, latent=32,
    # end_channels=4, upsamplings=2, batch=2.
    IMG, LATENT, EC, UPS, BATCH = 16, 32, 4, 2, 2

    key = jax.random.PRNGKey(0)
    kz, kp = jax.random.split(key)
    z = jax.random.normal(kz, (BATCH, LATENT), dtype=jnp.float32)
    params = init_params(kp, LATENT, IMG, EC, UPS)
    prep = prepare_params(params)

    fwd = jax.jit(lambda zz, pp: decoder_forward(zz, pp, IMG, EC, UPS))
    out = jax.block_until_ready(fwd(z, prep))

    assert out.shape == (BATCH, 3, IMG, IMG), out.shape
    ref = reference_forward(z, params, IMG, EC, UPS)
    max_err = float(jnp.max(jnp.abs(out - ref)))
    # bf16 MXU inputs (single pass) vs f32 HIGHEST reference => relaxed atol.
    assert max_err < 2e-2, f"mismatch vs reference, max abs err = {max_err}"

    print("KERNEL_OK")
</pallas_src>

<mosaic_0001>
module attributes {stable_mosaic.version = 11 : i64} {
  func.func @_mlp_kernel(%arg0: memref<2x32xbf16, #tpu.memory_space<vmem>>, %arg1: memref<32x128xbf16, #tpu.memory_space<vmem>>, %arg2: memref<1x128xf32, #tpu.memory_space<vmem>>, %arg3: memref<128x256xbf16, #tpu.memory_space<vmem>>, %arg4: memref<1x256xf32, #tpu.memory_space<vmem>>, %arg5: memref<2x256xf32, #tpu.memory_space<vmem>>) attributes {dimension_semantics = [], scalar_prefetch = 0 : i64, scratch_operands = 0 : i64, tpu.core_type = #tpu.core_type<tc>} {
    %c0 = arith.constant 0 : index
    %c0_0 = arith.constant 0 : index
    %0 = vector.load %arg0[%c0, %c0_0] : memref<2x32xbf16, #tpu.memory_space<vmem>>, vector<2x32xbf16>
    %c0_1 = arith.constant 0 : index
    %c0_2 = arith.constant 0 : index
    %1 = vector.load %arg1[%c0_1, %c0_2] : memref<32x128xbf16, #tpu.memory_space<vmem>>, vector<32x128xbf16>
    %cst = arith.constant dense<0.000000e+00> : vector<2x128xf32>
    %2 = tpu.matmul %0, %1, %cst {dimension_numbers = #tpu.dot_dimension_numbers<[1], [0], [0], [1], [0, 0, 1, 1], [], []>} : vector<2x32xbf16>, vector<32x128xbf16>, vector<2x128xf32> -> vector<2x128xf32>
    %c0_3 = arith.constant 0 : index
    %c0_4 = arith.constant 0 : index
    %3 = vector.load %arg2[%c0_3, %c0_4] : memref<1x128xf32, #tpu.memory_space<vmem>>, vector<1x128xf32>
    %4 = vector.broadcast %3 : vector<1x128xf32> to vector<2x128xf32>
    %5 = arith.addf %2, %4 : vector<2x128xf32>
    %cst_5 = arith.constant 0.000000e+00 : f32
    %6 = vector.broadcast %cst_5 : f32 to vector<2x128xf32>
    %7 = arith.maximumf %5, %6 : vector<2x128xf32>
    %8 = arith.truncf %7 : vector<2x128xf32> to vector<2x128xbf16>
    %c0_6 = arith.constant 0 : index
    %c0_7 = arith.constant 0 : index
    %9 = vector.load %arg3[%c0_6, %c0_7] : memref<128x256xbf16, #tpu.memory_space<vmem>>, vector<128x256xbf16>
    %cst_8 = arith.constant dense<0.000000e+00> : vector<2x256xf32>
    %10 = tpu.matmul %8, %9, %cst_8 {dimension_numbers = #tpu.dot_dimension_numbers<[1], [0], [0], [1], [0, 0, 1, 1], [], []>} : vector<2x128xbf16>, vector<128x256xbf16>, vector<2x256xf32> -> vector<2x256xf32>
    %c0_9 = arith.constant 0 : index
    %c0_10 = arith.constant 0 : index
    %11 = vector.load %arg4[%c0_9, %c0_10] : memref<1x256xf32, #tpu.memory_space<vmem>>, vector<1x256xf32>
    %12 = vector.broadcast %11 : vector<1x256xf32> to vector<2x256xf32>
    %13 = arith.addf %10, %12 : vector<2x256xf32>
    %c0_11 = arith.constant 0 : index
    %c0_12 = arith.constant 0 : index
    %14 = vector.load %arg5[%c0_11, %c0_12] : memref<2x256xf32, #tpu.memory_space<vmem>>, vector<2x256xf32>
    tpu.vector_store %arg5[%c0_11, %c0_12], %13 {strides = array<i32>} : memref<2x256xf32, #tpu.memory_space<vmem>>, vector<2x256xf32>,
    return
  }
}

module attributes {stable_mosaic.version = 11 : i64} {
  func.func @_convt_stats_kernel(%arg0: i32, %arg1: memref<32x144xbf16, #tpu.memory_space<vmem>>, %arg2: memref<144x32xbf16, #tpu.memory_space<vmem>>, %arg3: memref<1x32xf32, #tpu.memory_space<vmem>>, %arg4: memref<32x32xf32, #tpu.memory_space<vmem>>, %arg5: memref<8x32xf32, #tpu.memory_space<vmem>>) attributes {dimension_semantics = [#tpu.dimension_semantics<parallel>], iteration_bounds = array<i64: 1>, scalar_prefetch = 0 : i64, scratch_operands = 0 : i64, tpu.core_type = #tpu.core_type<tc>, window_params = [{transform_indices = @transform_0, window_bounds = array<i64: 32, 144>}, {pipeline_mode = #tpu.pipeline_mode<synchronous>, transform_indices = @transform_1, window_bounds = array<i64: 144, 32>}, {pipeline_mode = #tpu.pipeline_mode<synchronous>, transform_indices = @transform_2, window_bounds = array<i64: 1, 32>}, {transform_indices = @transform_3, window_bounds = array<i64: 32, 32>}, {transform_indices = @transform_4, window_bounds = array<i64: 8, 32>}]} {
    %c0 = arith.constant 0 : index
    %c0_0 = arith.constant 0 : index
    %0 = vector.load %arg1[%c0, %c0_0] : memref<32x144xbf16, #tpu.memory_space<vmem>>, vector<32x144xbf16>
    %c0_1 = arith.constant 0 : index
    %c0_2 = arith.constant 0 : index
    %1 = vector.load %arg2[%c0_1, %c0_2] : memref<144x32xbf16, #tpu.memory_space<vmem>>, vector<144x32xbf16>
    %cst = arith.constant dense<0.000000e+00> : vector<32x32xf32>
    %2 = tpu.matmul %0, %1, %cst {dimension_numbers = #tpu.dot_dimension_numbers<[1], [0], [0], [1], [0, 0, 1, 1], [], []>} : vector<32x144xbf16>, vector<144x32xbf16>, vector<32x32xf32> -> vector<32x32xf32>
    %c0_3 = arith.constant 0 : index
    %c0_4 = arith.constant 0 : index
    %3 = vector.load %arg3[%c0_3, %c0_4] : memref<1x32xf32, #tpu.memory_space<vmem>>, vector<1x32xf32>
    %4 = vector.broadcast %3 : vector<1x32xf32> to vector<32x32xf32>
    %5 = arith.addf %2, %4 : vector<32x32xf32>
    %c0_5 = arith.constant 0 : index
    %c0_6 = arith.constant 0 : index
    %6 = vector.load %arg4[%c0_5, %c0_6] : memref<32x32xf32, #tpu.memory_space<vmem>>, vector<32x32xf32>
    tpu.vector_store %arg4[%c0_5, %c0_6], %5 {strides = array<i32>} : memref<32x32xf32, #tpu.memory_space<vmem>>, vector<32x32xf32>,
    %cst_7 = arith.constant dense<0.000000e+00> : vector<32xf32>
    %7 = vector.multi_reduction <add>, %5, %cst_7 [0] : vector<32x32xf32> to vector<32xf32>
    %8 = vector.shape_cast %7 : vector<32xf32> to vector<1x32xf32>
    %9 = arith.mulf %5, %5 : vector<32x32xf32>
    %cst_8 = arith.constant dense<0.000000e+00> : vector<32xf32>
    %10 = vector.multi_reduction <add>, %9, %cst_8 [0] : vector<32x32xf32> to vector<32xf32>
    %11 = vector.shape_cast %10 : vector<32xf32> to vector<1x32xf32>
    %cst_9 = arith.constant 0.000000e+00 : f32
    %12 = vector.broadcast %cst_9 : f32 to vector<6x32xf32>
    %13 = tpu.concatenate %8, %11, %12 in 0 : vector<1x32xf32>, vector<1x32xf32>, vector<6x32xf32> -> vector<8x32xf32>
    %c0_10 = arith.constant 0 : index
    %c0_11 = arith.constant 0 : index
    %14 = vector.load %arg5[%c0_10, %c0_11] : memref<8x32xf32, #tpu.memory_space<vmem>>, vector<8x32xf32>
    tpu.vector_store %arg5[%c0_10, %c0_11], %13 {strides = array<i32>} : memref<8x32xf32, #tpu.memory_space<vmem>>, vector<8x32xf32>,
    return
  }
  func.func @transform_0(%arg0: i32) -> (i32, i32) {
    %c0_i32 = arith.constant 0 : i32
    %c0_i32_0 = arith.constant 0 : i32
    return %arg0, %c0_i32 : i32, i32
  }
  func.func @transform_1(%arg0: i32) -> (i32, i32) {
    %c0_i32 = arith.constant 0 : i32
    %c0_i32_0 = arith.constant 0 : i32
    %c0_i32_1 = arith.constant 0 : i32
    return %c0_i32, %c0_i32_0 : i32, i32
  }
  func.func @transform_2(%arg0: i32) -> (i32, i32) {
    %c0_i32 = arith.constant 0 : i32
    %c0_i32_0 = arith.constant 0 : i32
    %c0_i32_1 = arith.constant 0 : i32
    return %c0_i32, %c0_i32_0 : i32, i32
  }
  func.func @transform_3(%arg0: i32) -> (i32, i32) {
    %c0_i32 = arith.constant 0 : i32
    %c0_i32_0 = arith.constant 0 : i32
    return %arg0, %c0_i32 : i32, i32
  }
  func.func @transform_4(%arg0: i32) -> (i32, i32) {
    %c0_i32 = arith.constant 0 : i32
    %c0_i32_0 = arith.constant 0 : i32
    return %arg0, %c0_i32 : i32, i32
  }
}

module attributes {stable_mosaic.version = 11 : i64} {
  func.func @_bn_relu_kernel(%arg0: i32, %arg1: memref<32x32xf32, #tpu.memory_space<vmem>>, %arg2: memref<1x32xf32, #tpu.memory_space<vmem>>, %arg3: memref<1x32xf32, #tpu.memory_space<vmem>>, %arg4: memref<32x32xf32, #tpu.memory_space<vmem>>) attributes {dimension_semantics = [#tpu.dimension_semantics<parallel>], iteration_bounds = array<i64: 1>, scalar_prefetch = 0 : i64, scratch_operands = 0 : i64, tpu.core_type = #tpu.core_type<tc>, window_params = [{transform_indices = @transform_0, window_bounds = array<i64: 32, 32>}, {pipeline_mode = #tpu.pipeline_mode<synchronous>, transform_indices = @transform_1, window_bounds = array<i64: 1, 32>}, {pipeline_mode = #tpu.pipeline_mode<synchronous>, transform_indices = @transform_2, window_bounds = array<i64: 1, 32>}, {transform_indices = @transform_3, window_bounds = array<i64: 32, 32>}]} {
    %c0 = arith.constant 0 : index
    %c0_0 = arith.constant 0 : index
    %0 = vector.load %arg1[%c0, %c0_0] : memref<32x32xf32, #tpu.memory_space<vmem>>, vector<32x32xf32>
    %c0_1 = arith.constant 0 : index
    %c0_2 = arith.constant 0 : index
    %1 = vector.load %arg2[%c0_1, %c0_2] : memref<1x32xf32, #tpu.memory_space<vmem>>, vector<1x32xf32>
    %2 = vector.broadcast %1 : vector<1x32xf32> to vector<32x32xf32>
    %3 = arith.mulf %0, %2 : vector<32x32xf32>
    %c0_3 = arith.constant 0 : index
    %c0_4 = arith.constant 0 : index
    %4 = vector.load %arg3[%c0_3, %c0_4] : memref<1x32xf32, #tpu.memory_space<vmem>>, vector<1x32xf32>
    %5 = vector.broadcast %4 : vector<1x32xf32> to vector<32x32xf32>
    %6 = arith.addf %3, %5 : vector<32x32xf32>
    %cst = arith.constant 0.000000e+00 : f32
    %7 = vector.broadcast %cst : f32 to vector<32x32xf32>
    %8 = arith.maximumf %6, %7 : vector<32x32xf32>
    %c0_5 = arith.constant 0 : index
    %c0_6 = arith.constant 0 : index
    %9 = vector.load %arg4[%c0_5, %c0_6] : memref<32x32xf32, #tpu.memory_space<vmem>>, vector<32x32xf32>
    tpu.vector_store %arg4[%c0_5, %c0_6], %8 {strides = array<i32>} : memref<32x32xf32, #tpu.memory_space<vmem>>, vector<32x32xf32>,
    return
  }
  func.func @transform_0(%arg0: i32) -> (i32, i32) {
    %c0_i32 = arith.constant 0 : i32
    %c0_i32_0 = arith.constant 0 : i32
    return %arg0, %c0_i32 : i32, i32
  }
  func.func @transform_1(%arg0: i32) -> (i32, i32) {
    %c0_i32 = arith.constant 0 : i32
    %c0_i32_0 = arith.constant 0 : i32
    %c0_i32_1 = arith.constant 0 : i32
    return %c0_i32, %c0_i32_0 : i32, i32
  }
  func.func @transform_2(%arg0: i32) -> (i32, i32) {
    %c0_i32 = arith.constant 0 : i32
    %c0_i32_0 = arith.constant 0 : i32
    %c0_i32_1 = arith.constant 0 : i32
    return %c0_i32, %c0_i32_0 : i32, i32
  }
  func.func @transform_3(%arg0: i32) -> (i32, i32) {
    %c0_i32 = arith.constant 0 : i32
    %c0_i32_0 = arith.constant 0 : i32
    return %arg0, %c0_i32 : i32, i32
  }
}

module attributes {stable_mosaic.version = 11 : i64} {
  func.func @_convt_stats_kernel(%arg0: i32, %arg1: memref<128x72xbf16, #tpu.memory_space<vmem>>, %arg2: memref<72x16xbf16, #tpu.memory_space<vmem>>, %arg3: memref<1x16xf32, #tpu.memory_space<vmem>>, %arg4: memref<128x16xf32, #tpu.memory_space<vmem>>, %arg5: memref<8x16xf32, #tpu.memory_space<vmem>>) attributes {dimension_semantics = [#tpu.dimension_semantics<parallel>], iteration_bounds = array<i64: 1>, scalar_prefetch = 0 : i64, scratch_operands = 0 : i64, tpu.core_type = #tpu.core_type<tc>, window_params = [{transform_indices = @transform_0, window_bounds = array<i64: 128, 72>}, {pipeline_mode = #tpu.pipeline_mode<synchronous>, transform_indices = @transform_1, window_bounds = array<i64: 72, 16>}, {pipeline_mode = #tpu.pipeline_mode<synchronous>, transform_indices = @transform_2, window_bounds = array<i64: 1, 16>}, {transform_indices = @transform_3, window_bounds = array<i64: 128, 16>}, {transform_indices = @transform_4, window_bounds = array<i64: 8, 16>}]} {
    %c0 = arith.constant 0 : index
    %c0_0 = arith.constant 0 : index
    %0 = vector.load %arg1[%c0, %c0_0] : memref<128x72xbf16, #tpu.memory_space<vmem>>, vector<128x72xbf16>
    %c0_1 = arith.constant 0 : index
    %c0_2 = arith.constant 0 : index
    %1 = vector.load %arg2[%c0_1, %c0_2] : memref<72x16xbf16, #tpu.memory_space<vmem>>, vector<72x16xbf16>
    %cst = arith.constant dense<0.000000e+00> : vector<128x16xf32>
    %2 = tpu.matmul %0, %1, %cst {dimension_numbers = #tpu.dot_dimension_numbers<[1], [0], [0], [1], [0, 0, 1, 1], [], []>} : vector<128x72xbf16>, vector<72x16xbf16>, vector<128x16xf32> -> vector<128x16xf32>
    %c0_3 = arith.constant 0 : index
    %c0_4 = arith.constant 0 : index
    %3 = vector.load %arg3[%c0_3, %c0_4] : memref<1x16xf32, #tpu.memory_space<vmem>>, vector<1x16xf32>
    %4 = vector.broadcast %3 : vector<1x16xf32> to vector<128x16xf32>
    %5 = arith.addf %2, %4 : vector<128x16xf32>
    %c0_5 = arith.constant 0 : index
    %c0_6 = arith.constant 0 : index
    %6 = vector.load %arg4[%c0_5, %c0_6] : memref<128x16xf32, #tpu.memory_space<vmem>>, vector<128x16xf32>
    tpu.vector_store %arg4[%c0_5, %c0_6], %5 {strides = array<i32>} : memref<128x16xf32, #tpu.memory_space<vmem>>, vector<128x16xf32>,
    %cst_7 = arith.constant dense<0.000000e+00> : vector<16xf32>
    %7 = vector.multi_reduction <add>, %5, %cst_7 [0] : vector<128x16xf32> to vector<16xf32>
    %8 = vector.shape_cast %7 : vector<16xf32> to vector<1x16xf32>
    %9 = arith.mulf %5, %5 : vector<128x16xf32>
    %cst_8 = arith.constant dense<0.000000e+00> : vector<16xf32>
    %10 = vector.multi_reduction <add>, %9, %cst_8 [0] : vector<128x16xf32> to vector<16xf32>
    %11 = vector.shape_cast %10 : vector<16xf32> to vector<1x16xf32>
    %cst_9 = arith.constant 0.000000e+00 : f32
    %12 = vector.broadcast %cst_9 : f32 to vector<6x16xf32>
    %13 = tpu.concatenate %8, %11, %12 in 0 : vector<1x16xf32>, vector<1x16xf32>, vector<6x16xf32> -> vector<8x16xf32>
    %c0_10 = arith.constant 0 : index
    %c0_11 = arith.constant 0 : index
    %14 = vector.load %arg5[%c0_10, %c0_11] : memref<8x16xf32, #tpu.memory_space<vmem>>, vector<8x16xf32>
    tpu.vector_store %arg5[%c0_10, %c0_11], %13 {strides = array<i32>} : memref<8x16xf32, #tpu.memory_space<vmem>>, vector<8x16xf32>,
    return
  }
  func.func @transform_0(%arg0: i32) -> (i32, i32) {
    %c0_i32 = arith.constant 0 : i32
    %c0_i32_0 = arith.constant 0 : i32
    return %arg0, %c0_i32 : i32, i32
  }
  func.func @transform_1(%arg0: i32) -> (i32, i32) {
    %c0_i32 = arith.constant 0 : i32
    %c0_i32_0 = arith.constant 0 : i32
    %c0_i32_1 = arith.constant 0 : i32
    return %c0_i32, %c0_i32_0 : i32, i32
  }
  func.func @transform_2(%arg0: i32) -> (i32, i32) {
    %c0_i32 = arith.constant 0 : i32
    %c0_i32_0 = arith.constant 0 : i32
    %c0_i32_1 = arith.constant 0 : i32
    return %c0_i32, %c0_i32_0 : i32, i32
  }
  func.func @transform_3(%arg0: i32) -> (i32, i32) {
    %c0_i32 = arith.constant 0 : i32
    %c0_i32_0 = arith.constant 0 : i32
    return %arg0, %c0_i32 : i32, i32
  }
  func.func @transform_4(%arg0: i32) -> (i32, i32) {
    %c0_i32 = arith.constant 0 : i32
    %c0_i32_0 = arith.constant 0 : i32
    return %arg0, %c0_i32 : i32, i32
  }
}

module attributes {stable_mosaic.version = 11 : i64} {
  func.func @_bn_relu_conv_tanh_kernel(%arg0: i32, %arg1: memref<128x16xf32, #tpu.memory_space<vmem>>, %arg2: memref<1x16xf32, #tpu.memory_space<vmem>>, %arg3: memref<1x16xf32, #tpu.memory_space<vmem>>, %arg4: memref<16x12xbf16, #tpu.memory_space<vmem>>, %arg5: memref<1x12xf32, #tpu.memory_space<vmem>>, %arg6: memref<128x12xf32, #tpu.memory_space<vmem>>) attributes {dimension_semantics = [#tpu.dimension_semantics<parallel>], iteration_bounds = array<i64: 1>, scalar_prefetch = 0 : i64, scratch_operands = 0 : i64, tpu.core_type = #tpu.core_type<tc>, window_params = [{transform_indices = @transform_0, window_bounds = array<i64: 128, 16>}, {pipeline_mode = #tpu.pipeline_mode<synchronous>, transform_indices = @transform_1, window_bounds = array<i64: 1, 16>}, {pipeline_mode = #tpu.pipeline_mode<synchronous>, transform_indices = @transform_2, window_bounds = array<i64: 1, 16>}, {pipeline_mode = #tpu.pipeline_mode<synchronous>, transform_indices = @transform_3, window_bounds = array<i64: 16, 12>}, {pipeline_mode = #tpu.pipeline_mode<synchronous>, transform_indices = @transform_4, window_bounds = array<i64: 1, 12>}, {transform_indices = @transform_5, window_bounds = array<i64: 128, 12>}]} {
    %c0 = arith.constant 0 : index
    %c0_0 = arith.constant 0 : index
    %0 = vector.load %arg1[%c0, %c0_0] : memref<128x16xf32, #tpu.memory_space<vmem>>, vector<128x16xf32>
    %c0_1 = arith.constant 0 : index
    %c0_2 = arith.constant 0 : index
    %1 = vector.load %arg2[%c0_1, %c0_2] : memref<1x16xf32, #tpu.memory_space<vmem>>, vector<1x16xf32>
    %2 = vector.broadcast %1 : vector<1x16xf32> to vector<128x16xf32>
    %3 = arith.mulf %0, %2 : vector<128x16xf32>
    %c0_3 = arith.constant 0 : index
    %c0_4 = arith.constant 0 : index
    %4 = vector.load %arg3[%c0_3, %c0_4] : memref<1x16xf32, #tpu.memory_space<vmem>>, vector<1x16xf32>
    %5 = vector.broadcast %4 : vector<1x16xf32> to vector<128x16xf32>
    %6 = arith.addf %3, %5 : vector<128x16xf32>
    %cst = arith.constant 0.000000e+00 : f32
    %7 = vector.broadcast %cst : f32 to vector<128x16xf32>
    %8 = arith.maximumf %6, %7 : vector<128x16xf32>
    %9 = arith.truncf %8 : vector<128x16xf32> to vector<128x16xbf16>
    %c0_5 = arith.constant 0 : index
    %c0_6 = arith.constant 0 : index
    %10 = vector.load %arg4[%c0_5, %c0_6] : memref<16x12xbf16, #tpu.memory_space<vmem>>, vector<16x12xbf16>
    %cst_7 = arith.constant dense<0.000000e+00> : vector<128x12xf32>
    %11 = tpu.matmul %9, %10, %cst_7 {dimension_numbers = #tpu.dot_dimension_numbers<[1], [0], [0], [1], [0, 0, 1, 1], [], []>} : vector<128x16xbf16>, vector<16x12xbf16>, vector<128x12xf32> -> vector<128x12xf32>
    %c0_8 = arith.constant 0 : index
    %c0_9 = arith.constant 0 : index
    %12 = vector.load %arg5[%c0_8, %c0_9] : memref<1x12xf32, #tpu.memory_space<vmem>>, vector<1x12xf32>
    %13 = vector.broadcast %12 : vector<1x12xf32> to vector<128x12xf32>
    %14 = arith.addf %11, %13 : vector<128x12xf32>
    %15 = math.tanh %14 : vector<128x12xf32>
    %c0_10 = arith.constant 0 : index
    %c0_11 = arith.constant 0 : index
    %16 = vector.load %arg6[%c0_10, %c0_11] : memref<128x12xf32, #tpu.memory_space<vmem>>, vector<128x12xf32>
    tpu.vector_store %arg6[%c0_10, %c0_11], %15 {strides = array<i32>} : memref<128x12xf32, #tpu.memory_space<vmem>>, vector<128x12xf32>,
    return
  }
  func.func @transform_0(%arg0: i32) -> (i32, i32) {
    %c0_i32 = arith.constant 0 : i32
    %c0_i32_0 = arith.constant 0 : i32
    return %arg0, %c0_i32 : i32, i32
  }
  func.func @transform_1(%arg0: i32) -> (i32, i32) {
    %c0_i32 = arith.constant 0 : i32
    %c0_i32_0 = arith.constant 0 : i32
    %c0_i32_1 = arith.constant 0 : i32
    return %c0_i32, %c0_i32_0 : i32, i32
  }
  func.func @transform_2(%arg0: i32) -> (i32, i32) {
    %c0_i32 = arith.constant 0 : i32
    %c0_i32_0 = arith.constant 0 : i32
    %c0_i32_1 = arith.constant 0 : i32
    return %c0_i32, %c0_i32_0 : i32, i32
  }
  func.func @transform_3(%arg0: i32) -> (i32, i32) {
    %c0_i32 = arith.constant 0 : i32
    %c0_i32_0 = arith.constant 0 : i32
    %c0_i32_1 = arith.constant 0 : i32
    return %c0_i32, %c0_i32_0 : i32, i32
  }
  func.func @transform_4(%arg0: i32) -> (i32, i32) {
    %c0_i32 = arith.constant 0 : i32
    %c0_i32_0 = arith.constant 0 : i32
    %c0_i32_1 = arith.constant 0 : i32
    return %c0_i32, %c0_i32_0 : i32, i32
  }
  func.func @transform_5(%arg0: i32) -> (i32, i32) {
    %c0_i32 = arith.constant 0 : i32
    %c0_i32_0 = arith.constant 0 : i32
    return %arg0, %c0_i32 : i32, i32
  }
}

</mosaic_0001>

<bundles_post_ra>
// kernel: _lambda_.5
= control target key start
LH: loop header
LB: loop body
LE: loop exit
PB: predicated region body
PF: predicated region fallthrough
CT: control target
= control target key end

     0   :  { %10 = vsyncpa [#allocation3], 0  ;;  %s438_s0 = inlined_call_operand.vmem [shape: bf16[2,32], index: 0, kind: input, shape index: {}]   ;;  %s439_s1 = inlined_call_operand.hbm [shape: bf16[32,128], index: 1, kind: input, shape index: {}]   ;;  %s440_s2 = inlined_call_operand.vmem [shape: f32[1,128], index: 2, kind: input, shape index: {}]   ;;  %s441_s3 = inlined_call_operand.hbm [shape: bf16[128,256], index: 3, kind: input, shape index: {}]   ;;  %s442_s4 = inlined_call_operand.vmem [shape: f32[1,256], index: 4, kind: input, shape index: {}]   ;;  %s443_s5 = inlined_call_operand.vmem [shape: f32[2,256], index: 5, kind: output, shape index: {}]  }
   0x1   :  { %s18_s20 = sshll.u32 %s439_s1, 4  ;;  %s19_s20 = int_to_ptr.hbm [resolvable:$true] %s18_s20 }
   0x2   :  { %11 = vsyncpa [#allocation5], 0  ;;  %s384_s21 = smov [#allocation2]   ;;  %s33_s25 = sshll.u32 %s441_s3, 4  ;;  %s34_s25 = int_to_ptr.hbm [resolvable:$true] %s33_s25 }
   0x3   :  { %s20_s22 = sshll.u32 %s384_s21, 4  ;;  %s385_s26 = smov 64   ;;  %s21_s22 = int_to_ptr.vmem [resolvable:$true] %s20_s22 }
   0x4   :  { %s386_s27 = smov 4   ;;  %s387_s28 = smov [#allocation4]  }
   0x5   :  { %26 = dma.hbm_to_vmem [thread:$0]  %s19_s20, 256, %s21_s22, [#allocation3], %s385_s26, %s385_s26, %s386_s27  }
   0x6   :  { %s35_s29 = sshll.u32 %s387_s28, 4  ;;  %s388_s30 = smov 128   ;;  %s36_s29 = int_to_ptr.vmem [resolvable:$true] %s35_s29 }
   0x7   :  { %s389_s6 = smov 8  }
   0x8   :  { %41 = dma.hbm_to_vmem [thread:$0]  %s34_s25, 2048, %s36_s29, [#allocation5], %s388_s30, %s388_s30, %s389_s6  }
   0x9   :  { %380 = dma.done.wait [#allocation3], 256  }
   0xa   :  { %381 = vsyncadd [#allocation3], 4294967040 }
   0xb   :  { %382 = dma.done.wait [#allocation5], 2048  }
   0xc   :  { %383 = vsyncadd [#allocation5], 4294965248  ;;  %v308_v0 = vld [vmem:[#allocation2 + $0x8] sm:$0xff]  ;;  %v307_v1 = vld [vmem:[#allocation2] sm:$0xff]  ;;  %vm74_vm0 = vcmask 261120   ;;  %vm224_vm1 = vcmask 1041408  }
   0xd   :  { %v301_v2 = vld [vmem:[#allocation4 + $0x70] sm:$0xf]  ;;  %v324_v3 = vld [vmem:[#allocation4 + $0x74] sm:$0xf0]  ;;  %v323_v4 = vld [vmem:[#allocation4 + $0x74] sm:$0xf]  ;;  %84 = vmatpush.bf16.msra.mxu0 %v308_v0 }
   0xe   :  { %v302_v5 = vor.u32 %v324_v3, %v301_v2  ;;  %v303_v6 = vld [vmem:[#allocation4 + $0x78] sm:$0xf0]  ;;  %v293_v7 = vld [vmem:[#allocation4 + $0x60] sm:$0xf]  ;;  %v322_v8 = vld [vmem:[#allocation4 + $0x64] sm:$0xf0] }
   0xf   :  { %v306_v9 = vor.u32 %v323_v4, %v303_v6  ;;  %v321_v10 = vld [vmem:[#allocation4 + $0x64] sm:$0xf]  ;;  %v295_v11 = vld [vmem:[#allocation4 + $0x68] sm:$0xf0]  ;;  %v294_v12 = vor.u32 %v322_v8, %v293_v7  ;;  %v285_v14 = vld [vmem:[#allocation4 + $0x50] sm:$0xf] }
  0x10   :  { %195 = vmatpush.bf16.msra.mxu1 %v302_v5  ;;  %v298_v13 = vor.u32 %v321_v10, %v295_v11  ;;  %v320_v15 = vld [vmem:[#allocation4 + $0x54] sm:$0xf0]  ;;  %v53_v16 = vld [vmem:[%s438_s0] sm:$0x1]  ;;  %v319_v17 = vld [vmem:[#allocation4 + $0x54] sm:$0xf] }
  0x11   :  { %208 = vmatpush.bf16.msra.mxu2 %v306_v9  ;;  %85 = vmatpush.bf16.msra.mxu0 %v307_v1  ;;  %v287_v18 = vld [vmem:[#allocation4 + $0x58] sm:$0xf0]  ;;  %v286_v19 = vor.u32 %v320_v15, %v285_v14  ;;  %v277_v21 = vld [vmem:[#allocation4 + $0x40] sm:$0xf]  ;;  %v318_v22 = vld [vmem:[#allocation4 + $0x44] sm:$0xf0] }
  0x12   :  { %v290_v20 = vor.u32 %v319_v17, %v287_v18  ;;  %v317_v23 = vld [vmem:[#allocation4 + $0x44] sm:$0xf]  ;;  %v279_v24 = vld [vmem:[#allocation4 + $0x48] sm:$0xf0]  ;;  %v278_v25 = vor.u32 %v318_v22, %v277_v21  ;;  %v269_v27 = vld [vmem:[#allocation4 + $0x30] sm:$0xf] }
  0x13   :  { %v282_v26 = vor.u32 %v317_v23, %v279_v24  ;;  %v316_v28 = vld [vmem:[#allocation4 + $0x34] sm:$0xf0]  ;;  %v315_v29 = vld [vmem:[#allocation4 + $0x34] sm:$0xf]  ;;  %v271_v30 = vld [vmem:[#allocation4 + $0x38] sm:$0xf0] }
  0x14   :  { %196 = vmatpush.bf16.msra.mxu1 %v294_v12  ;;  %242 = vmatmul.msk.bf16.vlgmr.msra.gmra.mxu0 %vm74_vm0, %v53_v16  ;;  %v270_v31 = vor.u32 %v316_v28, %v269_v27  ;;  %v274_v32 = vor.u32 %v315_v29, %v271_v30  ;;  %v261_v33 = vld [vmem:[#allocation4 + $0x20] sm:$0xf]  ;;  %v314_v34 = vld [vmem:[#allocation4 + $0x24] sm:$0xf0]  ;;  %v313_v35 = vld [vmem:[#allocation4 + $0x24] sm:$0xf] }
  0x15   :  { %209 = vmatpush.bf16.msra.mxu2 %v298_v13  ;;  %v263_v36 = vld [vmem:[#allocation4 + $0x28] sm:$0xf0]  ;;  %v262_v37 = vor.u32 %v314_v34, %v261_v33  ;;  %v253_v39 = vld [vmem:[#allocation4 + $0x10] sm:$0xf]  ;;  %v312_v40 = vld [vmem:[#allocation4 + $0x14] sm:$0xf0] }
  0x16   :  { %v266_v38 = vor.u32 %v313_v35, %v263_v36  ;;  %v311_v41 = vld [vmem:[#allocation4 + $0x14] sm:$0xf]  ;;  %v254_v42 = vor.u32 %v312_v40, %v253_v39  ;;  %v255_v43 = vld [vmem:[#allocation4 + $0x18] sm:$0xf0]  ;;  %v245_v45 = vld [vmem:[#allocation4] sm:$0xf] }
  0x17   :  { %v258_v44 = vor.u32 %v311_v41, %v255_v43  ;;  %v310_v46 = vld [vmem:[#allocation4 + $0x4] sm:$0xf0]  ;;  %v309_v47 = vld [vmem:[#allocation4 + $0x4] sm:$0xf]  ;;  %v247_v49 = vld [vmem:[#allocation4 + $0x8] sm:$0xf0] }
  0x18   :  { %197 = vmatpush.bf16.msra.mxu1 %v286_v19  ;;  %v246_v48 = vor.u32 %v310_v46, %v245_v45  ;;  %v250_v50 = vor.u32 %v309_v47, %v247_v49  ;;  %v331_v51 = vld [vmem:[%s440_s2] ss:$0 sm:$0xff] }
  0x19   :  { %210 = vmatpush.bf16.msra.mxu2 %v290_v20  ;;  %v109_v58 = vld [vmem:[%s442_s4] sm:$0x3] }
  0x1a   :  { %v112_v59 = vperm.slane %v109_v58, 1  ;;  %v111_v60 = vperm.slane %v109_v58, 0 }
  0x1c   :  { %198 = vmatpush.bf16.msra.mxu1 %v278_v25 }
  0x1d   :  { %211 = vmatpush.bf16.msra.mxu2 %v282_v26 }
  0x20   :  { %199 = vmatpush.bf16.msra.mxu1 %v270_v31 }
  0x21   :  { %212 = vmatpush.bf16.msra.mxu2 %v274_v32 }
  0x24   :  { %200 = vmatpush.bf16.msra.mxu1 %v262_v37 }
  0x25   :  { %213 = vmatpush.bf16.msra.mxu2 %v266_v38 }
  0x28   :  { %201 = vmatpush.bf16.msra.mxu1 %v254_v42 }
  0x29   :  { %214 = vmatpush.bf16.msra.mxu2 %v258_v44 }
  0x2c   :  { %202 = vmatpush.bf16.msra.mxu1 %v246_v48 }
  0x2d   :  { %215 = vmatpush.bf16.msra.mxu2 %v250_v50 }
  0x91   :  { %v87_v52 = vpop.f32.mrf.mxu0 }
  0x92   :  { %v88_v53 = vadd.f32 %v331_v51, %v87_v52 }
  0x94   :  { %v91_v54 = vmax.f32 %v88_v53, 0.0 }
  0x96   :  { %v92_v55 = vpack.c.bf16 %v91_v54, %v91_v54 }
  0x98   :  { %203 = vmatmul.bf16.vlgmr.msra.gmra.mxu1 %v92_v55  ;;  %216 = vmatmul.bf16.vlgmr.msra.gmra.mxu2 %v92_v55 }
  0x99   :  { %v89_v56 = vpop.f32.mrf.mxu0 }
 0x115   :  { %v204_v57 = vpop.f32.mrf.mxu1 }
 0x116   :  { %v205_v0 = vadd.f32 %v204_v57, %v111_v60 }
 0x11b   :  { %v217_v61 = vpop.f32.mrf.mxu2 }
 0x11c   :  { %v218_v62 = vadd.f32 %v217_v61, %v112_v59 }
 0x11d   :  { %v206_v63 = vpop.f32.mrf.mxu1 }
 0x11e   :  { %v223_v1 = vrot.slane %v218_v62, 6 }
 0x120   :  { %v225_v2 = vsel %vm224_vm1, %v205_v0, %v223_v1 }
 0x121   :  { %227 = vst [vmem:[%s443_s5] sm:$0xf] %v225_v2 }
 0x123   :  { %v219_v3 = vpop.f32.mrf.mxu2 }
 0x124   :  { %232 = vsyncpa [#allocation3], 1 }
 0x125   :  { %233 = vsyncpa [#allocation5], 1 }

// kernel: tile.23
= control target key start
LH: loop header
LB: loop body
LE: loop exit
PB: predicated region body
PF: predicated region fallthrough
CT: control target
= control target key end

     0   :  { %s22_s0 = inlined_call_operand.vmem [shape: f32[8], index: 0, kind: input, shape index: {}]   ;;  %s23_s1 = inlined_call_operand.vmem [shape: f32[4,8], index: 1, kind: output, shape index: {}]  }
   0x1   :  { %v4_v0 = vld [vmem:[%s22_s0] ss:$0 sm:$0xff] }
   0x2   :  { %5 = vst [vmem:[%s23_s1] sm:$0xf] %v4_v0 }

// kernel: tile.24
= control target key start
LH: loop header
LB: loop body
LE: loop exit
PB: predicated region body
PF: predicated region fallthrough
CT: control target
= control target key end

     0   :  { %s37_s8 = smov 8   ;;  %s38_s9 = smov 16   ;;  %vm7_vm0 = vcmask 64512   ;;  %vm13_vm1 = vcmask 261312   ;;  %vm19_vm2 = vcmask 195712   ;;  %vm25_vm3 = vcmask 130112   ;;  %s55_s0 = inlined_call_operand.vmem [shape: f32[4,8], index: 0, kind: input, shape index: {}]   ;;  %s56_s1 = inlined_call_operand.vmem [shape: f32[1,32], index: 1, kind: output, shape index: {}]  }
   0x1   :  { %v4_v0 = vld [vmem:[%s55_s0] sm:$0xf]  ;;  %s36_s0 = smov 24  }
   0x2   :  { %5 = vst [vmem:[#allocation1] sm:$0xf] %v4_v0 }
   0x9   :  { %v10_v1 = vld [vmem:[#allocation1 + $0x3] sm:$0x1]   ;;  %v22_v2 = vld [vmem:[#allocation1 + $0x1] sm:$0x1]   ;;  %v16_v3 = vld [vmem:[#allocation1 + $0x2] sm:$0x1]  }
   0xa   :  { %11 = vrot.lane.b32.xlu0 %v10_v1, %s36_s0  ;;  %23 = vrot.lane.b32.xlu1 %v22_v2, %s37_s8  ;;  %v6_v4 = vld [vmem:[#allocation1] sm:$0x1]  }
   0xb   :  { %8 = vst.msk [vmem:[#allocation0] sm:$0x1] %vm7_vm0, %v6_v4  }
  0x12   :  { %17 = vrot.lane.b32.xlu0 %v16_v3, %s38_s9 }
  0x7c   :  { %v12_v5 = vpop.permute.xlu0 %11   ;;  %v24_v6 = vpop.permute.xlu1 %23  }
  0x7d   :  { %14 = vst.msk [vmem:[#allocation0] sm:$0x1] %vm13_vm1, %v12_v5  }
  0x84   :  { %v18_v7 = vpop.permute.xlu0 %17  }
  0x85   :  { %20 = vst.msk [vmem:[#allocation0] sm:$0x1] %vm19_vm2, %v18_v7  }
  0x86   :  { %26 = vst.msk [vmem:[#allocation0] sm:$0x1] %vm25_vm3, %v24_v6  }
  0x8d   :  { %v29_v8 = vld [vmem:[#allocation0] sm:$0x1] }
  0x8e   :  { %32 = vst [vmem:[%s56_s1] sm:$0x1] %v29_v8 }

// kernel: _lambda_.6
= control target key start
LH: loop header
LB: loop body
LE: loop exit
PB: predicated region body
PF: predicated region fallthrough
CT: control target
= control target key end

     0   :  { %vm115_vm0 = vcmask 130048   ;;  %vm160_vm1 = vcmask 261120   ;;  %vm195_vm2 = vcmask 1040384   ;;  %vm197_vm3 = vcmask 1041408   ;;  %s393_s1 = inlined_call_operand.vmem [shape: bf16[144,32], index: 1, kind: input, shape index: {}]   ;;  %s394_s0 = inlined_call_operand.vmem [shape: bf16[32,144], index: 0, kind: input, shape index: {}]   ;;  %s395_s2 = inlined_call_operand.vmem [shape: f32[1,32], index: 2, kind: input, shape index: {}]   ;;  %s396_s3 = inlined_call_operand.vmem [shape: f32[32,32], index: 3, kind: output, shape index: {0}]   ;;  %s397_s4 = inlined_call_operand.vmem [shape: f32[8,32], index: 4, kind: output, shape index: {1}]  }
   0x1   :  { %v273_v0 = vld [vmem:[%s393_s1 + $0x38] sm:$0xff]  ;;  %v274_v1 = vld [vmem:[%s393_s1 + $0x40] sm:$0xff]  ;;  %v272_v3 = vld [vmem:[%s393_s1 + $0x30] sm:$0xff] }
   0x2   :  { %v262_v2 = vld [vmem:[%s394_s0 + $0x4] sm:$0xf]  ;;  %122 = vmatpush.bf16.msra.mxu0 %v273_v0  ;;  %275 = vmatpush.bf16.msra.mxu2 %v273_v0  ;;  %v212_v4 = vld [vmem:[%s394_s0 + $0x8] sm:$0xf0]  ;;  %v269_v8 = vld [vmem:[%s393_s1 + $0x18] sm:$0xff] }
   0x3   :  { %148 = vmatpush.bf16.msra.mxu1 %v274_v1  ;;  %v215_v5 = vor.u32 %v262_v2, %v212_v4  ;;  %v271_v6 = vld [vmem:[%s393_s1 + $0x28] sm:$0xff]  ;;  %v270_v7 = vld [vmem:[%s393_s1 + $0x20] sm:$0xff]  ;;  %v264_v9 = vld [vmem:[%s394_s0 + $0x14] sm:$0xf] }
   0x4   :  { %v220_v10 = vld [vmem:[%s394_s0 + $0x18] sm:$0xf0]  ;;  %v268_v11 = vld [vmem:[%s393_s1 + $0x10] sm:$0xff]  ;;  %v267_v13 = vld [vmem:[%s393_s1 + $0x8] sm:$0xff] }
   0x5   :  { %v223_v12 = vor.u32 %v264_v9, %v220_v10  ;;  %v266_v14 = vld [vmem:[%s393_s1] sm:$0xff]  ;;  %v263_v16 = vld [vmem:[%s394_s0 + $0x4] sm:$0xf0]  ;;  %v218_v17 = vld [vmem:[%s394_s0 + $0x10] sm:$0xf] }
   0x6   :  { %123 = vmatpush.bf16.msra.mxu0 %v272_v3  ;;  %276 = vmatpush.bf16.msra.mxu2 %v272_v3  ;;  %v210_v15 = vld [vmem:[%s394_s0] sm:$0xf]  ;;  %v265_v18 = vld [vmem:[%s394_s0 + $0x14] sm:$0xf0] }
   0x7   :  { %260 = vmatmul.msk.bf16.vlgmr.msra.gmra.mxu1 %vm115_vm0, %v215_v5  ;;  %v211_v19 = vor.u32 %v263_v16, %v210_v15  ;;  %v219_v20 = vor.u32 %v265_v18, %v218_v17  ;;  %v283_v23 = vld [vmem:[%s395_s2] ss:$0 sm:$0xff] }
   0xa   :  { %124 = vmatpush.bf16.msra.mxu0 %v271_v6  ;;  %277 = vmatpush.bf16.msra.mxu2 %v271_v6 }
   0xe   :  { %125 = vmatpush.bf16.msra.mxu0 %v270_v7  ;;  %278 = vmatpush.bf16.msra.mxu2 %v270_v7 }
  0x12   :  { %126 = vmatpush.bf16.msra.mxu0 %v269_v8  ;;  %279 = vmatpush.bf16.msra.mxu2 %v269_v8 }
  0x16   :  { %127 = vmatpush.bf16.msra.mxu0 %v268_v11  ;;  %280 = vmatpush.bf16.msra.mxu2 %v268_v11 }
  0x17   :  { %261 = vmatmul.msk.bf16.gmra.mxu1 %vm115_vm0, %v223_v12 }
  0x1a   :  { %128 = vmatpush.bf16.msra.mxu0 %v267_v13  ;;  %281 = vmatpush.bf16.msra.mxu2 %v267_v13 }
  0x1e   :  { %129 = vmatpush.bf16.msra.mxu0 %v266_v14  ;;  %282 = vmatpush.bf16.msra.mxu2 %v266_v14 }
  0x21   :  { %130 = vmatmul.bf16.vlgmr.msra.gmra.mxu0 %v211_v19  ;;  %135 = vmatmul.bf16.vlgmr.msra.gmra.mxu2 %v219_v20 }
  0x84   :  { %v150_v21 = vpop.f32.mrf.mxu1 }
  0x8c   :  { %v152_v22 = vpop.f32.mrf.mxu1 }
  0x94   :  { %v155_v27 = vpop.f32.mrf.mxu1 }
  0x9c   :  { %v157_v45 = vpop.f32.mrf.mxu1 }
  0x9e   :  { %v131_v24 = vpop.f32.mrf.mxu0 }
  0x9f   :  { %v132_v25 = vadd.f32 %v283_v23, %v131_v24 }
  0xa1   :  { %v151_v26 = vadd.f32 %v150_v21, %v132_v25 }
  0xa3   :  { %161 = vst.msk [vmem:[%s396_s3] sm:$0xff] %vm160_vm1, %v151_v26  ;;  %v178_v33 = vmul.f32 %v151_v26, %v151_v26  ;;  %v165_v35 = vsel %vm160_vm1, %v151_v26, 0.0 }
  0xa4   :  { %v136_v28 = vpop.f32.mrf.mxu2 }
  0xa5   :  { %v137_v29 = vadd.f32 %v283_v23, %v136_v28  ;;  %v182_v40 = vsel %vm160_vm1, %v178_v33, 0.0 }
  0xa6   :  { %v133_v30 = vpop.f32.mrf.mxu0 }
  0xa7   :  { %v156_v31 = vadd.f32 %v155_v27, %v137_v29  ;;  %v134_v32 = vadd.f32 %v283_v23, %v133_v30 }
  0xa9   :  { %163 = vst.msk [vmem:[%s396_s3 + $0x10] sm:$0xff] %vm160_vm1, %v156_v31  ;;  %v153_v34 = vadd.f32 %v152_v22, %v134_v32  ;;  %v180_v41 = vmul.f32 %v156_v31, %v156_v31  ;;  %v168_v46 = vsel %vm160_vm1, %v156_v31, 0.0 }
  0xab   :  { %162 = vst.msk [vmem:[%s396_s3 + $0x8] sm:$0xff] %vm160_vm1, %v153_v34  ;;  %v166_v36 = vsel %vm160_vm1, %v153_v34, 0.0  ;;  %v179_v37 = vmul.f32 %v153_v34, %v153_v34  ;;  %v185_v49 = vsel %vm160_vm1, %v180_v41, 0.0 }
  0xac   :  { %v167_v38 = vadd.f32 %v166_v36, %v165_v35  ;;  %v138_v39 = vpop.f32.mrf.mxu2 }
  0xad   :  { %v183_v42 = vsel %vm160_vm1, %v179_v37, 0.0  ;;  %v139_v43 = vadd.f32 %v283_v23, %v138_v39 }
  0xae   :  { %v184_v44 = vadd.f32 %v183_v42, %v182_v40  ;;  %v169_v48 = vadd.f32 %v168_v46, %v167_v38 }
  0xaf   :  { %v158_v47 = vadd.f32 %v157_v45, %v139_v43 }
  0xb0   :  { %v186_v53 = vadd.f32 %v185_v49, %v184_v44 }
  0xb1   :  { %164 = vst.msk [vmem:[%s396_s3 + $0x18] sm:$0xff] %vm160_vm1, %v158_v47  ;;  %v170_v50 = vsel %vm160_vm1, %v158_v47, 0.0  ;;  %v181_v51 = vmul.f32 %v158_v47, %v158_v47 }
  0xb2   :  { %v171_v52 = vadd.f32 %v170_v50, %v169_v48 }
  0xb3   :  { %v187_v54 = vsel %vm160_vm1, %v181_v51, 0.0 }
  0xb4   :  { %v172_v55 = vrot.slane %v171_v52, 4  ;;  %v188_v56 = vadd.f32 %v187_v54, %v186_v53 }
  0xb6   :  { %v173_v57 = vadd.f32 %v172_v55, %v171_v52  ;;  %v189_v58 = vrot.slane %v188_v56, 4 }
  0xb8   :  { %v174_v59 = vrot.slane %v173_v57, 2  ;;  %v190_v60 = vadd.f32 %v189_v58, %v188_v56 }
  0xba   :  { %v175_v61 = vadd.f32 %v174_v59, %v173_v57  ;;  %v191_v62 = vrot.slane %v190_v60, 2 }
  0xbc   :  { %v176_v63 = vrot.slane %v175_v61, 1  ;;  %v192_v0 = vadd.f32 %v191_v62, %v190_v60 }
  0xbe   :  { %v193_v1 = vrot.slane %v192_v0, 1  ;;  %v177_v2 = vadd.f32 %v176_v63, %v175_v61 }
  0xc0   :  { %v194_v3 = vadd.f32 %v193_v1, %v192_v0 }
  0xc2   :  { %v196_v4 = vsel %vm195_vm2, %v177_v2, %v194_v3 }
  0xc3   :  { %v198_v5 = vsel %vm197_vm3, %v196_v4, 0.0 }
  0xc4   :  { %199 = vst.msk [vmem:[%s397_s4] sm:$0xff] %vm160_vm1, %v198_v5 }

// kernel: _lambda_.7
= control target key start
LH: loop header
LB: loop body
LE: loop exit
PB: predicated region body
PF: predicated region fallthrough
CT: control target
= control target key end

     0   :  { %vm38_vm0 = vcmask 261120   ;;  %s99_s0 = inlined_call_operand.vmem [shape: f32[32,32], index: 0, kind: input, shape index: {}]   ;;  %s100_s1 = inlined_call_operand.vmem [shape: f32[1,32], index: 1, kind: input, shape index: {}]   ;;  %s101_s2 = inlined_call_operand.vmem [shape: f32[1,32], index: 2, kind: input, shape index: {}]   ;;  %s102_s3 = inlined_call_operand.vmem [shape: f32[32,32], index: 3, kind: output, shape index: {}]  }
   0x1   :  { %v14_v0 = vld [vmem:[%s99_s0] sm:$0xff]  ;;  %v15_v3 = vld [vmem:[%s99_s0 + $0x8] sm:$0xff]  ;;  %v16_v6 = vld [vmem:[%s99_s0 + $0x10] sm:$0xff] }
   0x2   :  { %v47_v1 = vld [vmem:[%s100_s1] ss:$0 sm:$0xff]  ;;  %v17_v7 = vld [vmem:[%s99_s0 + $0x18] sm:$0xff] }
   0x3   :  { %v48_v2 = vld [vmem:[%s101_s2] ss:$0 sm:$0xff]  ;;  %v22_v4 = vmul.f32 %v47_v1, %v14_v0  ;;  %v23_v5 = vmul.f32 %v47_v1, %v15_v3  ;;  %v24_v8 = vmul.f32 %v47_v1, %v16_v6  ;;  %v25_v9 = vmul.f32 %v47_v1, %v17_v7 }
   0x5   :  { %v30_v10 = vadd.f32 %v48_v2, %v22_v4  ;;  %v31_v11 = vadd.f32 %v48_v2, %v23_v5  ;;  %v32_v12 = vadd.f32 %v48_v2, %v24_v8  ;;  %v33_v13 = vadd.f32 %v48_v2, %v25_v9 }
   0x7   :  { %v34_v14 = vmax.f32 %v30_v10, 0.0  ;;  %v35_v15 = vmax.f32 %v31_v11, 0.0  ;;  %v36_v16 = vmax.f32 %v32_v12, 0.0  ;;  %v37_v17 = vmax.f32 %v33_v13, 0.0 }
   0x9   :  { %39 = vst.msk [vmem:[%s102_s3] sm:$0xff] %vm38_vm0, %v34_v14 }
   0xa   :  { %40 = vst.msk [vmem:[%s102_s3 + $0x8] sm:$0xff] %vm38_vm0, %v35_v15 }
   0xb   :  { %41 = vst.msk [vmem:[%s102_s3 + $0x10] sm:$0xff] %vm38_vm0, %v36_v16 }
   0xc   :  { %42 = vst.msk [vmem:[%s102_s3 + $0x18] sm:$0xff] %vm38_vm0, %v37_v17 }

// kernel: tile.33
= control target key start
LH: loop header
LB: loop body
LE: loop exit
PB: predicated region body
PF: predicated region fallthrough
CT: control target
= control target key end

     0   :  { %s22_s0 = inlined_call_operand.vmem [shape: f32[4], index: 0, kind: input, shape index: {}]   ;;  %s23_s1 = inlined_call_operand.vmem [shape: f32[4,4], index: 1, kind: output, shape index: {}]  }
   0x1   :  { %v4_v0 = vld [vmem:[%s22_s0] ss:$0 sm:$0xff] }
   0x2   :  { %5 = vst [vmem:[%s23_s1] sm:$0xf] %v4_v0 }

// kernel: tile.34
= control target key start
LH: loop header
LB: loop body
LE: loop exit
PB: predicated region body
PF: predicated region fallthrough
CT: control target
= control target key end

     0   :  { %s37_s8 = smov 4   ;;  %s38_s9 = smov 8   ;;  %vm7_vm0 = vcmask 31744   ;;  %vm13_vm1 = vcmask 130144   ;;  %vm19_vm2 = vcmask 97344   ;;  %vm25_vm3 = vcmask 64544   ;;  %s55_s0 = inlined_call_operand.vmem [shape: f32[4,4], index: 0, kind: input, shape index: {}]   ;;  %s56_s1 = inlined_call_operand.vmem [shape: f32[1,16], index: 1, kind: output, shape index: {}]  }
   0x1   :  { %v4_v0 = vld [vmem:[%s55_s0] sm:$0xf]  ;;  %s36_s0 = smov 12  }
   0x2   :  { %5 = vst [vmem:[#allocation1] sm:$0xf] %v4_v0 }
   0x9   :  { %v10_v1 = vld [vmem:[#allocation1 + $0x3] sm:$0x1]   ;;  %v22_v2 = vld [vmem:[#allocation1 + $0x1] sm:$0x1]   ;;  %v16_v3 = vld [vmem:[#allocation1 + $0x2] sm:$0x1]  }
   0xa   :  { %11 = vrot.lane.b32.xlu0 %v10_v1, %s36_s0  ;;  %23 = vrot.lane.b32.xlu1 %v22_v2, %s37_s8  ;;  %v6_v4 = vld [vmem:[#allocation1] sm:$0x1]  }
   0xb   :  { %8 = vst.msk [vmem:[#allocation0] sm:$0x1] %vm7_vm0, %v6_v4  }
  0x12   :  { %17 = vrot.lane.b32.xlu0 %v16_v3, %s38_s9 }
  0x7c   :  { %v12_v5 = vpop.permute.xlu0 %11   ;;  %v24_v6 = vpop.permute.xlu1 %23  }
  0x7d   :  { %14 = vst.msk [vmem:[#allocation0] sm:$0x1] %vm13_vm1, %v12_v5  }
  0x84   :  { %v18_v7 = vpop.permute.xlu0 %17  }
  0x85   :  { %20 = vst.msk [vmem:[#allocation0] sm:$0x1] %vm19_vm2, %v18_v7  }
  0x86   :  { %26 = vst.msk [vmem:[#allocation0] sm:$0x1] %vm25_vm3, %v24_v6  }
  0x8d   :  { %v29_v8 = vld [vmem:[#allocation0] sm:$0x1] }
  0x8e   :  { %32 = vst [vmem:[%s56_s1] sm:$0x1] %v29_v8 }

// kernel: _lambda_.8
= control target key start
LH: loop header
LB: loop body
LE: loop exit
PB: predicated region body
PF: predicated region fallthrough
CT: control target
= control target key end

     0   :  { %vm138_vm0 = vcmask 1043456   ;;  %vm113_vm1 = vcmask 588800   ;;  %vm191_vm2 = vcmask 130048   ;;  %vm298_vm3 = vcmask 1040384   ;;  %s618_s1 = inlined_call_operand.vmem [shape: bf16[72,16], index: 1, kind: input, shape index: {}]   ;;  %s619_s2 = inlined_call_operand.vmem [shape: f32[1,16], index: 2, kind: input, shape index: {}]   ;;  %s620_s0 = inlined_call_operand.vmem [shape: bf16[128,72], index: 0, kind: input, shape index: {}]   ;;  %s621_s3 = inlined_call_operand.vmem [shape: f32[128,16], index: 3, kind: output, shape index: {0}]   ;;  %s622_s4 = inlined_call_operand.vmem [shape: f32[8,16], index: 4, kind: output, shape index: {1}]  }
   0x1   :  { %v41_v0 = vld [vmem:[%s618_s1 + $0x20] sm:$0xf]  ;;  %v378_v4 = vld [vmem:[%s618_s1 + $0x18] sm:$0xff]  ;;  %v377_v5 = vld [vmem:[%s618_s1 + $0x10] sm:$0xff]  ;;  %vm300_vm4 = vcmask 1041408  }
   0x2   :  { %v103_v1 = vunpack.c.l.b16 %v41_v0  ;;  %v376_v6 = vld [vmem:[%s618_s1 + $0x8] sm:$0xff]  ;;  %v375_v7 = vld [vmem:[%s618_s1] sm:$0xff]  ;;  %v369_v9 = vld [vmem:[%s620_s0 + $0x10] sm:$0xff] }
   0x3   :  { %v367_v8 = vld [vmem:[%s620_s0] sm:$0xff]  ;;  %v373_v11 = vld [vmem:[%s620_s0 + $0x30] sm:$0xff]  ;;  %v368_v12 = vld [vmem:[%s620_s0 + $0x8] sm:$0xff] }
   0x4   :  { %v108_v2 = vpack.c.b16 %v103_v1, %v103_v1  ;;  %v371_v10 = vld [vmem:[%s620_s0 + $0x20] sm:$0xff]  ;;  %v370_v13 = vld [vmem:[%s620_s0 + $0x18] sm:$0xff]  ;;  %v372_v14 = vld [vmem:[%s620_s0 + $0x28] sm:$0xff] }
   0x5   :  { %v374_v15 = vld [vmem:[%s620_s0 + $0x38] sm:$0xff]  ;;  %v470_v16 = vld [vmem:[%s619_s2] ss:$0 sm:$0xff] }
   0x6   :  { %v140_v3 = vsel %vm138_vm0, %v108_v2, 0 }
   0x7   :  { %145 = vmatpush.bf16.msra.mxu0 %v140_v3  ;;  %379 = vmatpush.bf16.msra.mxu1 %v140_v3 }
   0x8   :  { %380 = vmatpush.bf16.msra.mxu2 %v140_v3  ;;  %381 = vmatpush.bf16.msra.mxu3 %v140_v3 }
   0xb   :  { %146 = vmatpush.bf16.msra.mxu0 %v378_v4  ;;  %382 = vmatpush.bf16.msra.mxu1 %v378_v4 }
   0xc   :  { %383 = vmatpush.bf16.msra.mxu2 %v378_v4  ;;  %384 = vmatpush.bf16.msra.mxu3 %v378_v4 }
   0xf   :  { %147 = vmatpush.bf16.msra.mxu0 %v377_v5  ;;  %385 = vmatpush.bf16.msra.mxu1 %v377_v5 }
  0x10   :  { %386 = vmatpush.bf16.msra.mxu2 %v377_v5  ;;  %387 = vmatpush.bf16.msra.mxu3 %v377_v5 }
  0x13   :  { %148 = vmatpush.bf16.msra.mxu0 %v376_v6  ;;  %388 = vmatpush.bf16.msra.mxu1 %v376_v6 }
  0x14   :  { %389 = vmatpush.bf16.msra.mxu2 %v376_v6  ;;  %390 = vmatpush.bf16.msra.mxu3 %v376_v6 }
  0x17   :  { %149 = vmatpush.bf16.msra.mxu0 %v375_v7  ;;  %391 = vmatpush.bf16.msra.mxu1 %v375_v7 }
  0x18   :  { %392 = vmatpush.bf16.msra.mxu2 %v375_v7  ;;  %393 = vmatpush.bf16.msra.mxu3 %v375_v7 }
  0x1a   :  { %359 = vmatmul.msk.bf16.vlgmr.msra.gmra.mxu0 %vm113_vm1, %v367_v8  ;;  %361 = vmatmul.msk.bf16.vlgmr.msra.gmra.mxu1 %vm113_vm1, %v369_v9 }
  0x1b   :  { %363 = vmatmul.msk.bf16.vlgmr.msra.gmra.mxu2 %vm113_vm1, %v371_v10  ;;  %365 = vmatmul.msk.bf16.vlgmr.msra.gmra.mxu3 %vm113_vm1, %v373_v11 }
  0x2a   :  { %360 = vmatmul.msk.bf16.gmra.mxu0 %vm113_vm1, %v368_v12  ;;  %362 = vmatmul.msk.bf16.gmra.mxu1 %vm113_vm1, %v370_v13 }
  0x2b   :  { %364 = vmatmul.msk.bf16.gmra.mxu2 %vm113_vm1, %v372_v14  ;;  %366 = vmatmul.msk.bf16.gmra.mxu3 %vm113_vm1, %v374_v15 }
  0x97   :  { %v151_v17 = vpop.f32.mrf.mxu0  ;;  %v161_v18 = vpop.f32.mrf.mxu1 }
  0x98   :  { %v152_v19 = vadd.f32 %v470_v16, %v151_v17  ;;  %v162_v20 = vadd.f32 %v470_v16, %v161_v18 }
  0x9a   :  { %192 = vst.msk [vmem:[%s621_s3] sm:$0xff] %vm191_vm2, %v152_v19  ;;  %v245_v38 = vmul.f32 %v152_v19, %v152_v19  ;;  %v208_v41 = vsel %vm191_vm2, %v152_v19, 0.0  ;;  %v249_v57 = vmul.f32 %v162_v20, %v162_v20  ;;  %v215_v62 = vsel %vm191_vm2, %v162_v20, 0.0 }
  0x9b   :  { %196 = vst.msk [vmem:[%s621_s3 + $0x20] sm:$0xff] %vm191_vm2, %v162_v20 }
  0x9c   :  { %v261_v46 = vsel %vm191_vm2, %v245_v38, 0.0  ;;  %v268_v3 = vsel %vm191_vm2, %v249_v57, 0.0 }
  0x9e   :  { %v171_v21 = vpop.f32.mrf.mxu2  ;;  %v181_v22 = vpop.f32.mrf.mxu3 }
  0x9f   :  { %v153_v23 = vpop.f32.mrf.mxu0  ;;  %v163_v24 = vpop.f32.mrf.mxu1  ;;  %v483_v25 = vadd.f32 %v470_v16, %v171_v21  ;;  %v488_v28 = vadd.f32 %v470_v16, %v181_v22 }
  0xa0   :  { %v154_v26 = vadd.f32 %v470_v16, %v153_v23  ;;  %v164_v27 = vadd.f32 %v470_v16, %v163_v24 }
  0xa1   :  { %200 = vst.msk [vmem:[%s621_s3 + $0x40] sm:$0xff] %vm191_vm2, %v483_v25  ;;  %v253_v18 = vmul.f32 %v483_v25, %v483_v25  ;;  %v223_v22 = vsel %vm191_vm2, %v483_v25, 0.0 }
  0xa2   :  { %193 = vst.msk [vmem:[%s621_s3 + $0x8] sm:$0xff] %vm191_vm2, %v154_v26  ;;  %v246_v37 = vmul.f32 %v154_v26, %v154_v26  ;;  %v209_v39 = vsel %vm191_vm2, %v154_v26, 0.0  ;;  %v250_v63 = vmul.f32 %v164_v27, %v164_v27  ;;  %v217_v4 = vsel %vm191_vm2, %v164_v27, 0.0 }
  0xa3   :  { %197 = vst.msk [vmem:[%s621_s3 + $0x28] sm:$0xff] %vm191_vm2, %v164_v27  ;;  %v210_v47 = vadd.f32 %v209_v39, %v208_v41 }
  0xa4   :  { %204 = vst.msk [vmem:[%s621_s3 + $0x60] sm:$0xff] %vm191_vm2, %v488_v28  ;;  %v262_v42 = vsel %vm191_vm2, %v246_v37, 0.0  ;;  %v270_v12 = vsel %vm191_vm2, %v250_v63, 0.0 }
  0xa5   :  { %v263_v55 = vadd.f32 %v262_v42, %v261_v46 }
  0xa6   :  { %v173_v29 = vpop.f32.mrf.mxu2  ;;  %v183_v30 = vpop.f32.mrf.mxu3 }
  0xa7   :  { %v156_v31 = vpop.f32.mrf.mxu0  ;;  %v166_v32 = vpop.f32.mrf.mxu1  ;;  %v509_v33 = vadd.f32 %v470_v16, %v173_v29  ;;  %v514_v36 = vadd.f32 %v470_v16, %v183_v30  ;;  %v276_v29 = vsel %vm191_vm2, %v253_v18, 0.0 }
  0xa8   :  { %v157_v34 = vadd.f32 %v470_v16, %v156_v31  ;;  %v167_v35 = vadd.f32 %v470_v16, %v166_v32 }
  0xa9   :  { %201 = vst.msk [vmem:[%s621_s3 + $0x48] sm:$0xff] %vm191_vm2, %v509_v33  ;;  %v254_v23 = vmul.f32 %v509_v33, %v509_v33  ;;  %v225_v30 = vsel %vm191_vm2, %v509_v33, 0.0  ;;  %v231_v33 = vsel %vm191_vm2, %v488_v28, 0.0 }
  0xaa   :  { %194 = vst.msk [vmem:[%s621_s3 + $0x10] sm:$0xff] %vm191_vm2, %v157_v34  ;;  %v247_v40 = vmul.f32 %v157_v34, %v157_v34  ;;  %v211_v43 = vsel %vm191_vm2, %v157_v34, 0.0  ;;  %v251_v5 = vmul.f32 %v167_v35, %v167_v35  ;;  %v219_v13 = vsel %vm191_vm2, %v167_v35, 0.0 }
  0xab   :  { %198 = vst.msk [vmem:[%s621_s3 + $0x30] sm:$0xff] %vm191_vm2, %v167_v35  ;;  %v212_v56 = vadd.f32 %v211_v43, %v210_v47  ;;  %v278_v35 = vsel %vm191_vm2, %v254_v23, 0.0 }
  0xac   :  { %205 = vst.msk [vmem:[%s621_s3 + $0x68] sm:$0xff] %vm191_vm2, %v514_v36  ;;  %v264_v51 = vsel %vm191_vm2, %v247_v40, 0.0  ;;  %v272_v19 = vsel %vm191_vm2, %v251_v5, 0.0  ;;  %v257_v40 = vmul.f32 %v488_v28, %v488_v28 }
  0xad   :  { %v265_v60 = vadd.f32 %v264_v51, %v263_v55 }
  0xae   :  { %v176_v44 = vpop.f32.mrf.mxu2  ;;  %v186_v45 = vpop.f32.mrf.mxu3 }
  0xaf   :  { %v158_v48 = vpop.f32.mrf.mxu0  ;;  %v168_v49 = vpop.f32.mrf.mxu1  ;;  %v177_v50 = vadd.f32 %v470_v16, %v176_v44  ;;  %v544_v54 = vadd.f32 %v470_v16, %v186_v45  ;;  %v258_v45 = vmul.f32 %v514_v36, %v514_v36 }
  0xb0   :  { %v159_v52 = vadd.f32 %v470_v16, %v158_v48  ;;  %v169_v53 = vadd.f32 %v470_v16, %v168_v49  ;;  %v284_v49 = vsel %vm191_vm2, %v257_v40, 0.0 }
  0xb1   :  { %202 = vst.msk [vmem:[%s621_s3 + $0x50] sm:$0xff] %vm191_vm2, %v177_v50  ;;  %v255_v31 = vmul.f32 %v177_v50, %v177_v50  ;;  %v227_v37 = vsel %vm191_vm2, %v177_v50, 0.0  ;;  %v233_v50 = vsel %vm191_vm2, %v514_v36, 0.0  ;;  %v259_v51 = vmul.f32 %v544_v54, %v544_v54 }
  0xb2   :  { %195 = vst.msk [vmem:[%s621_s3 + $0x18] sm:$0xff] %vm191_vm2, %v159_v52  ;;  %v213_v58 = vsel %vm191_vm2, %v159_v52, 0.0  ;;  %v248_v59 = vmul.f32 %v159_v52, %v159_v52  ;;  %v252_v14 = vmul.f32 %v169_v53, %v169_v53  ;;  %v221_v20 = vsel %vm191_vm2, %v169_v53, 0.0 }
  0xb3   :  { %v214_v61 = vadd.f32 %v213_v58, %v212_v56  ;;  %199 = vst.msk [vmem:[%s621_s3 + $0x38] sm:$0xff] %vm191_vm2, %v169_v53  ;;  %v280_v41 = vsel %vm191_vm2, %v255_v31, 0.0  ;;  %v286_v55 = vsel %vm191_vm2, %v258_v45, 0.0  ;;  %v235_v28 = vsel %vm191_vm2, %v544_v54, 0.0 }
  0xb4   :  { %v266_v0 = vsel %vm191_vm2, %v248_v59, 0.0  ;;  %206 = vst.msk [vmem:[%s621_s3 + $0x70] sm:$0xff] %vm191_vm2, %v544_v54  ;;  %v274_v24 = vsel %vm191_vm2, %v252_v14, 0.0  ;;  %v288_v59 = vsel %vm191_vm2, %v259_v51, 0.0 }
  0xb5   :  { %v216_v1 = vadd.f32 %v215_v62, %v214_v61  ;;  %v267_v2 = vadd.f32 %v266_v0, %v265_v60 }
  0xb6   :  { %v178_v6 = vpop.f32.mrf.mxu2  ;;  %v188_v7 = vpop.f32.mrf.mxu3 }
  0xb7   :  { %v269_v8 = vadd.f32 %v268_v3, %v267_v2  ;;  %v218_v9 = vadd.f32 %v217_v4, %v216_v1  ;;  %v179_v10 = vadd.f32 %v470_v16, %v178_v6  ;;  %v189_v11 = vadd.f32 %v470_v16, %v188_v7 }
  0xb9   :  { %v220_v15 = vadd.f32 %v219_v13, %v218_v9  ;;  %v271_v17 = vadd.f32 %v270_v12, %v269_v8  ;;  %203 = vst.msk [vmem:[%s621_s3 + $0x58] sm:$0xff] %vm191_vm2, %v179_v10  ;;  %v256_v25 = vmul.f32 %v179_v10, %v179_v10  ;;  %v229_v42 = vsel %vm191_vm2, %v179_v10, 0.0 }
  0xba   :  { %207 = vst.msk [vmem:[%s621_s3 + $0x78] sm:$0xff] %vm191_vm2, %v189_v11  ;;  %v260_v56 = vmul.f32 %v189_v11, %v189_v11  ;;  %v237_v60 = vsel %vm191_vm2, %v189_v11, 0.0 }
  0xbb   :  { %v222_v16 = vadd.f32 %v221_v20, %v220_v15  ;;  %v273_v21 = vadd.f32 %v272_v19, %v271_v17  ;;  %v282_v46 = vsel %vm191_vm2, %v256_v25, 0.0 }
  0xbc   :  { %v290_v36 = vsel %vm191_vm2, %v260_v56, 0.0 }
  0xbd   :  { %v224_v26 = vadd.f32 %v223_v22, %v222_v16  ;;  %v275_v27 = vadd.f32 %v274_v24, %v273_v21 }
  0xbf   :  { %v277_v32 = vadd.f32 %v276_v29, %v275_v27  ;;  %v226_v34 = vadd.f32 %v225_v30, %v224_v26 }
  0xc1   :  { %v228_v38 = vadd.f32 %v227_v37, %v226_v34  ;;  %v279_v39 = vadd.f32 %v278_v35, %v277_v32 }
  0xc3   :  { %v281_v43 = vadd.f32 %v280_v41, %v279_v39  ;;  %v230_v44 = vadd.f32 %v229_v42, %v228_v38 }
  0xc5   :  { %v232_v47 = vadd.f32 %v231_v33, %v230_v44  ;;  %v283_v48 = vadd.f32 %v282_v46, %v281_v43 }
  0xc7   :  { %v285_v52 = vadd.f32 %v284_v49, %v283_v48  ;;  %v234_v53 = vadd.f32 %v233_v50, %v232_v47 }
  0xc9   :  { %v236_v57 = vadd.f32 %v235_v28, %v234_v53  ;;  %v287_v58 = vadd.f32 %v286_v55, %v285_v52 }
  0xcb   :  { %v289_v61 = vadd.f32 %v288_v59, %v287_v58  ;;  %v238_v62 = vadd.f32 %v237_v60, %v236_v57 }
  0xcd   :  { %v239_v63 = vrot.slane %v238_v62, 4  ;;  %v291_v0 = vadd.f32 %v290_v36, %v289_v61 }
  0xcf   :  { %v240_v1 = vadd.f32 %v239_v63, %v238_v62  ;;  %v292_v2 = vrot.slane %v291_v0, 4 }
  0xd1   :  { %v241_v3 = vrot.slane %v240_v1, 2  ;;  %v293_v4 = vadd.f32 %v292_v2, %v291_v0 }
  0xd3   :  { %v242_v5 = vadd.f32 %v241_v3, %v240_v1  ;;  %v294_v6 = vrot.slane %v293_v4, 2 }
  0xd5   :  { %v243_v54 = vrot.slane %v242_v5, 1  ;;  %v295_v7 = vadd.f32 %v294_v6, %v293_v4 }
  0xd7   :  { %v296_v8 = vrot.slane %v295_v7, 1  ;;  %v244_v9 = vadd.f32 %v243_v54, %v242_v5 }
  0xd9   :  { %v297_v10 = vadd.f32 %v296_v8, %v295_v7 }
  0xdb   :  { %v299_v11 = vsel %vm298_vm3, %v244_v9, %v297_v10 }
  0xdc   :  { %v301_v12 = vsel %vm300_vm4, %v299_v11, 0.0 }
  0xdd   :  { %302 = vst.msk [vmem:[%s622_s4] sm:$0xff] %vm191_vm2, %v301_v12 }

// kernel: _lambda_.9
= control target key start
LH: loop header
LB: loop body
LE: loop exit
PB: predicated region body
PF: predicated region fallthrough
CT: control target
= control target key end

     0   :  { %vm113_vm0 = vcmask 130048   ;;  %vm203_vm1 = vcmask 97280   ;;  %s473_s3 = inlined_call_operand.vmem [shape: bf16[16,12], index: 3, kind: input, shape index: {}]   ;;  %s474_s0 = inlined_call_operand.vmem [shape: f32[128,16], index: 0, kind: input, shape index: {}]   ;;  %s475_s1 = inlined_call_operand.vmem [shape: f32[1,16], index: 1, kind: input, shape index: {}]   ;;  %s476_s2 = inlined_call_operand.vmem [shape: f32[1,16], index: 2, kind: input, shape index: {}]   ;;  %s477_s4 = inlined_call_operand.vmem [shape: f32[1,12], index: 4, kind: input, shape index: {}]   ;;  %s478_s5 = inlined_call_operand.vmem [shape: f32[128,12], index: 5, kind: output, shape index: {}]  }
   0x1   :  { %v236_v0 = vld [vmem:[%s473_s3] sm:$0xff]  ;;  %v22_v2 = vld [vmem:[%s474_s0 + $0x8] sm:$0xff]  ;;  %v23_v30 = vld [vmem:[%s474_s0 + $0x10] sm:$0xff] }
   0x2   :  { %v21_v1 = vld [vmem:[%s474_s0] sm:$0xff]  ;;  %145 = vmatpush.bf16.msra.mxu0 %v236_v0  ;;  %237 = vmatpush.bf16.msra.mxu1 %v236_v0  ;;  %v26_v6 = vld [vmem:[%s474_s0 + $0x28] sm:$0xff]  ;;  %v24_v35 = vld [vmem:[%s474_s0 + $0x18] sm:$0xff] }
   0x3   :  { %v240_v3 = vld [vmem:[%s475_s1] ss:$0 sm:$0xff]  ;;  %238 = vmatpush.bf16.msra.mxu2 %v236_v0  ;;  %239 = vmatpush.bf16.msra.mxu3 %v236_v0  ;;  %v30_v11 = vld [vmem:[%s474_s0 + $0x48] sm:$0xff]  ;;  %v27_v36 = vld [vmem:[%s474_s0 + $0x30] sm:$0xff] }
   0x4   :  { %v320_v4 = vld [vmem:[%s476_s2] ss:$0 sm:$0xff]  ;;  %v41_v7 = vmul.f32 %v240_v3, %v21_v1  ;;  %v42_v8 = vmul.f32 %v240_v3, %v22_v2  ;;  %v46_v13 = vmul.f32 %v240_v3, %v26_v6  ;;  %v50_v15 = vmul.f32 %v240_v3, %v30_v11  ;;  %v34_v16 = vld [vmem:[%s474_s0 + $0x68] sm:$0xff]  ;;  %v28_v39 = vld [vmem:[%s474_s0 + $0x38] sm:$0xff] }
   0x5   :  { %v25_v5 = vld [vmem:[%s474_s0 + $0x20] sm:$0xff]  ;;  %v54_v21 = vmul.f32 %v240_v3, %v34_v16  ;;  %v31_v40 = vld [vmem:[%s474_s0 + $0x50] sm:$0xff]  ;;  %v32_v41 = vld [vmem:[%s474_s0 + $0x58] sm:$0xff]  ;;  %v43_v46 = vmul.f32 %v240_v3, %v23_v30  ;;  %v44_v47 = vmul.f32 %v240_v3, %v24_v35  ;;  %v47_v48 = vmul.f32 %v240_v3, %v27_v36 }
   0x6   :  { %v45_v9 = vmul.f32 %v240_v3, %v25_v5  ;;  %v29_v10 = vld [vmem:[%s474_s0 + $0x40] sm:$0xff]  ;;  %v61_v18 = vadd.f32 %v320_v4, %v41_v7  ;;  %v62_v19 = vadd.f32 %v320_v4, %v42_v8  ;;  %v66_v22 = vadd.f32 %v320_v4, %v46_v13  ;;  %v35_v44 = vld [vmem:[%s474_s0 + $0x70] sm:$0xff]  ;;  %v36_v49 = vld [vmem:[%s474_s0 + $0x78] sm:$0xff] }
   0x7   :  { %v33_v12 = vld [vmem:[%s474_s0 + $0x60] sm:$0xff]  ;;  %v49_v14 = vmul.f32 %v240_v3, %v29_v10  ;;  %v70_v24 = vadd.f32 %v320_v4, %v50_v15  ;;  %v74_v29 = vadd.f32 %v320_v4, %v54_v21  ;;  %v48_v50 = vmul.f32 %v240_v3, %v28_v39 }
   0x8   :  { %v53_v17 = vmul.f32 %v240_v3, %v33_v12  ;;  %v65_v20 = vadd.f32 %v320_v4, %v45_v9  ;;  %v77_v26 = vmax.f32 %v61_v18, 0.0  ;;  %v78_v27 = vmax.f32 %v62_v19, 0.0 }
   0x9   :  { %v69_v23 = vadd.f32 %v320_v4, %v49_v14  ;;  %v82_v31 = vmax.f32 %v66_v22, 0.0  ;;  %v86_v33 = vmax.f32 %v70_v24, 0.0  ;;  %v90_v38 = vmax.f32 %v74_v29, 0.0 }
   0xa   :  { %v73_v25 = vadd.f32 %v320_v4, %v53_v17  ;;  %v81_v28 = vmax.f32 %v65_v20, 0.0  ;;  %v93_v37 = vpack.c.bf16 %v78_v27, %v77_v26  ;;  %v51_v51 = vmul.f32 %v240_v3, %v31_v40 }
   0xb   :  { %v85_v32 = vmax.f32 %v69_v23, 0.0  ;;  %v52_v52 = vmul.f32 %v240_v3, %v32_v41  ;;  %v55_v53 = vmul.f32 %v240_v3, %v35_v44  ;;  %v56_v54 = vmul.f32 %v240_v3, %v36_v49 }
   0xc   :  { %v89_v34 = vmax.f32 %v73_v25, 0.0  ;;  %v95_v42 = vpack.c.bf16 %v82_v31, %v81_v28  ;;  %228 = vmatmul.msk.bf16.vlgmr.msra.gmra.mxu0 %vm113_vm0, %v93_v37  ;;  %v63_v55 = vadd.f32 %v320_v4, %v43_v46  ;;  %v64_v56 = vadd.f32 %v320_v4, %v44_v47 }
   0xd   :  { %v97_v43 = vpack.c.bf16 %v86_v33, %v85_v32  ;;  %v67_v57 = vadd.f32 %v320_v4, %v47_v48  ;;  %v68_v58 = vadd.f32 %v320_v4, %v48_v50  ;;  %v71_v59 = vadd.f32 %v320_v4, %v51_v51 }
   0xe   :  { %v99_v45 = vpack.c.bf16 %v90_v38, %v89_v34  ;;  %230 = vmatmul.msk.bf16.vlgmr.msra.gmra.mxu1 %vm113_vm0, %v95_v42  ;;  %v72_v60 = vadd.f32 %v320_v4, %v52_v52  ;;  %v75_v61 = vadd.f32 %v320_v4, %v55_v53  ;;  %v76_v62 = vadd.f32 %v320_v4, %v56_v54  ;;  %v391_v4 = vld [vmem:[%s477_s4] ss:$0 sm:$0xff] }
   0xf   :  { %232 = vmatmul.msk.bf16.vlgmr.msra.gmra.mxu2 %vm113_vm0, %v97_v43  ;;  %v79_v63 = vmax.f32 %v63_v55, 0.0  ;;  %v80_v0 = vmax.f32 %v64_v56, 0.0  ;;  %v83_v1 = vmax.f32 %v67_v57, 0.0  ;;  %v84_v2 = vmax.f32 %v68_v58, 0.0 }
  0x10   :  { %234 = vmatmul.msk.bf16.vlgmr.msra.gmra.mxu3 %vm113_vm0, %v99_v45  ;;  %v87_v3 = vmax.f32 %v71_v59, 0.0  ;;  %v88_v5 = vmax.f32 %v72_v60, 0.0  ;;  %v91_v6 = vmax.f32 %v75_v61, 0.0  ;;  %v92_v7 = vmax.f32 %v76_v62, 0.0 }
  0x11   :  { %v94_v8 = vpack.c.bf16 %v80_v0, %v79_v63  ;;  %v96_v9 = vpack.c.bf16 %v84_v2, %v83_v1 }
  0x12   :  { %v98_v10 = vpack.c.bf16 %v88_v5, %v87_v3  ;;  %v100_v11 = vpack.c.bf16 %v92_v7, %v91_v6 }
  0x1c   :  { %229 = vmatmul.msk.bf16.gmra.mxu0 %vm113_vm0, %v94_v8 }
  0x1e   :  { %231 = vmatmul.msk.bf16.gmra.mxu1 %vm113_vm0, %v96_v9 }
  0x1f   :  { %233 = vmatmul.msk.bf16.gmra.mxu2 %vm113_vm0, %v98_v10 }
  0x20   :  { %235 = vmatmul.msk.bf16.gmra.mxu3 %vm113_vm0, %v100_v11 }
  0x89   :  { %v147_v12 = vpop.f32.mrf.mxu0 }
  0x8a   :  { %v148_v13 = vadd.f32 %v391_v4, %v147_v12 }
  0x8b   :  { %v157_v14 = vpop.f32.mrf.mxu1 }
  0x8c   :  { %v158_v15 = vadd.f32 %v391_v4, %v157_v14  ;;  %243 = vtanh.f32 %v148_v13 }
  0x8e   :  { %245 = vtanh.f32 %v158_v15 }
  0x91   :  { %v149_v19 = vpop.f32.mrf.mxu0 }
  0x92   :  { %v167_v16 = vpop.f32.mrf.mxu2  ;;  %v244_v20 = vpop.eup %243  ;;  %v150_v22 = vadd.f32 %v391_v4, %v149_v19 }
  0x93   :  { %v168_v17 = vadd.f32 %v391_v4, %v167_v16  ;;  %v177_v18 = vpop.f32.mrf.mxu3  ;;  %v159_v23 = vpop.f32.mrf.mxu1  ;;  %204 = vst.msk [vmem:[%s478_s5] sm:$0xff] %vm203_vm1, %v244_v20 }
  0x94   :  { %v178_v21 = vadd.f32 %v391_v4, %v177_v18  ;;  %v246_v24 = vpop.eup %245  ;;  %v160_v25 = vadd.f32 %v391_v4, %v159_v23 }
  0x95   :  { %247 = vtanh.f32 %v168_v17  ;;  %208 = vst.msk [vmem:[%s478_s5 + $0x20] sm:$0xff] %vm203_vm1, %v246_v24 }
  0x96   :  { %249 = vtanh.f32 %v178_v21 }
  0x97   :  { %251 = vtanh.f32 %v150_v22 }
  0x98   :  { %253 = vtanh.f32 %v160_v25 }
  0x99   :  { %v152_v30 = vpop.f32.mrf.mxu0 }
  0x9a   :  { %v169_v26 = vpop.f32.mrf.mxu2  ;;  %v153_v33 = vadd.f32 %v391_v4, %v152_v30 }
  0x9b   :  { %v248_v27 = vpop.eup %247  ;;  %v170_v28 = vadd.f32 %v391_v4, %v169_v26  ;;  %v179_v29 = vpop.f32.mrf.mxu3 }
  0x9c   :  { %v250_v31 = vpop.eup %249  ;;  %212 = vst.msk [vmem:[%s478_s5 + $0x40] sm:$0xff] %vm203_vm1, %v248_v27  ;;  %v180_v32 = vadd.f32 %v391_v4, %v179_v29  ;;  %v162_v34 = vpop.f32.mrf.mxu1 }
  0x9d   :  { %v252_v35 = vpop.eup %251  ;;  %216 = vst.msk [vmem:[%s478_s5 + $0x60] sm:$0xff] %vm203_vm1, %v250_v31  ;;  %255 = vtanh.f32 %v170_v28  ;;  %v163_v36 = vadd.f32 %v391_v4, %v162_v34 }
  0x9e   :  { %v254_v37 = vpop.eup %253  ;;  %205 = vst.msk [vmem:[%s478_s5 + $0x8] sm:$0xff] %vm203_vm1, %v252_v35  ;;  %257 = vtanh.f32 %v180_v32 }
  0x9f   :  { %209 = vst.msk [vmem:[%s478_s5 + $0x28] sm:$0xff] %vm203_vm1, %v254_v37  ;;  %259 = vtanh.f32 %v153_v33 }
  0xa0   :  { %261 = vtanh.f32 %v163_v36 }
  0xa1   :  { %v154_v42 = vpop.f32.mrf.mxu0 }
  0xa2   :  { %v172_v38 = vpop.f32.mrf.mxu2  ;;  %v155_v45 = vadd.f32 %v391_v4, %v154_v42 }
  0xa3   :  { %v256_v39 = vpop.eup %255  ;;  %v173_v40 = vadd.f32 %v391_v4, %v172_v38  ;;  %v182_v41 = vpop.f32.mrf.mxu3 }
  0xa4   :  { %v258_v43 = vpop.eup %257  ;;  %213 = vst.msk [vmem:[%s478_s5 + $0x48] sm:$0xff] %vm203_vm1, %v256_v39  ;;  %v183_v44 = vadd.f32 %v391_v4, %v182_v41  ;;  %v164_v46 = vpop.f32.mrf.mxu1 }
  0xa5   :  { %v260_v47 = vpop.eup %259  ;;  %217 = vst.msk [vmem:[%s478_s5 + $0x68] sm:$0xff] %vm203_vm1, %v258_v43  ;;  %263 = vtanh.f32 %v173_v40  ;;  %v165_v48 = vadd.f32 %v391_v4, %v164_v46 }
  0xa6   :  { %v262_v49 = vpop.eup %261  ;;  %206 = vst.msk [vmem:[%s478_s5 + $0x10] sm:$0xff] %vm203_vm1, %v260_v47  ;;  %265 = vtanh.f32 %v183_v44 }
  0xa7   :  { %210 = vst.msk [vmem:[%s478_s5 + $0x30] sm:$0xff] %vm203_vm1, %v262_v49  ;;  %267 = vtanh.f32 %v155_v45 }
  0xa8   :  { %269 = vtanh.f32 %v165_v48 }
  0xaa   :  { %v174_v50 = vpop.f32.mrf.mxu2 }
  0xab   :  { %v264_v51 = vpop.eup %263  ;;  %v175_v52 = vadd.f32 %v391_v4, %v174_v50  ;;  %v184_v53 = vpop.f32.mrf.mxu3 }
  0xac   :  { %v266_v54 = vpop.eup %265  ;;  %214 = vst.msk [vmem:[%s478_s5 + $0x50] sm:$0xff] %vm203_vm1, %v264_v51  ;;  %v185_v55 = vadd.f32 %v391_v4, %v184_v53 }
  0xad   :  { %v268_v56 = vpop.eup %267  ;;  %218 = vst.msk [vmem:[%s478_s5 + $0x70] sm:$0xff] %vm203_vm1, %v266_v54  ;;  %271 = vtanh.f32 %v175_v52 }
  0xae   :  { %v270_v57 = vpop.eup %269  ;;  %207 = vst.msk [vmem:[%s478_s5 + $0x18] sm:$0xff] %vm203_vm1, %v268_v56  ;;  %273 = vtanh.f32 %v185_v55 }
  0xaf   :  { %211 = vst.msk [vmem:[%s478_s5 + $0x38] sm:$0xff] %vm203_vm1, %v270_v57 }
  0xb3   :  { %v272_v58 = vpop.eup %271 }
  0xb4   :  { %v274_v59 = vpop.eup %273  ;;  %215 = vst.msk [vmem:[%s478_s5 + $0x58] sm:$0xff] %vm203_vm1, %v272_v58 }
  0xb5   :  { %219 = vst.msk [vmem:[%s478_s5 + $0x78] sm:$0xff] %vm203_vm1, %v274_v59 }

</bundles_post_ra>
